<compile_context>
chip_gen: v7x
topology: tpu7x:2x2x1
jax: 0.10.0
libtpu: 0.0.40
codegen_flags: <defaults>
</compile_context>

<pallas_src>
import jax
import jax.numpy as jnp
from jax import lax
from jax.experimental import pallas as pl
from jax.experimental.pallas import tpu as pltpu

NUM_FEATURES = 60   # self.num_features
N_CODES = 5         # self.n_diagnosis_codes
EMB_SIZE = 5        # self.emb_size
HIDDEN = 10         # self.hidden_size
HIDDEN_CH = 15      # self.hidden_channels
NUM_CLASSES = 3     # self.num_classes
NEW_FEATURES = 20   # self.num_new_features
TOPK = 6            # a.topk(6, dim=1)


def gnn_kernel(xc_ref, y_ref, wemb_ref,
               wfc_ref, bfc_ref, wfc2_ref, bfc2_ref,
               wl1_ref, wr1_ref, bl1_ref,
               wl2_ref, wr2_ref, bl2_ref,
               wlin_ref, blin_ref,
               probs_ref, x3_ref, out_ref, adj_ref):
    f32 = jnp.float32
    N = y_ref.shape[0]
    EMB = wemb_ref.shape[0]
    HID = wfc2_ref.shape[2]

    # ---- Stage 1: embedding mix -> fc -> fc2, decomposed per embedding channel
    # x3[n,:] = relu( sum_e relu( relu(sum_c Wemb[c,e]*Xc[c]) @ WfcT + bfc ) @ Wfc2_e + bfc2 )
    acc = jnp.zeros((N, HID), dtype=f32)
    for e in range(EMB):
        g = wemb_ref[0, e] * xc_ref[0]                    # scalar (SMEM) * (N, 60) on the VPU
        for c in range(1, EMB):
            g = g + wemb_ref[c, e] * xc_ref[c]
        g = jnp.maximum(g, 0.0)                           # relu, (N, 60)
        z = jnp.dot(g, wfc_ref[...], preferred_element_type=f32) + bfc_ref[...]
        z = jnp.maximum(z, 0.0)                           # (N, 20)
        acc = acc + jnp.dot(z, wfc2_ref[e], preferred_element_type=f32)
    x3 = jnp.maximum(acc + bfc2_ref[...], 0.0)            # (N, 10)
    x3_ref[...] = x3

    # ---- Stage 2: label-masked cosine similarity (A @ B.T via dot_general, no transposes)
    y = y_ref[...]
    label = lax.dot_general(y, y, (((1,), (1,)), ((), ())), preferred_element_type=f32)
    label = jnp.where(label > 0, 1.0, label)
    nrm2 = jnp.sum(x3 * x3, axis=1, keepdims=True)        # (N, 1)
    inv_n = lax.rsqrt(jnp.maximum(nrm2, 1e-24))           # guard: torch would NaN on zero rows
    xn = x3 * inv_n
    a = lax.dot_general(xn, xn, (((1,), (1,)), ((), ())), preferred_element_type=f32) * label

    # ---- Stage 3: top-5 neighbours (ranks 2..6 of topk(6)), iterative argmax.
    # Ties broken toward the lowest column index (matches a stable descending sort).
    col = lax.broadcasted_iota(jnp.int32, (N, N), 1)
    row = lax.broadcasted_iota(jnp.int32, (N, N), 0)
    eye = (row == col).astype(f32)
    colf = col.astype(f32)
    work = a                                              # a >= 0 everywhere
    accA = jnp.zeros((N, N), dtype=f32)
    for k in range(TOPK):
        m = jnp.max(work, axis=1, keepdims=True)
        cand = jnp.where(work == m, colf, float(N))
        idx = jnp.min(cand, axis=1, keepdims=True)        # lowest-index argmax
        onehot = (colf == idx).astype(f32)
        if k > 0:                                         # drop rank 0 (the self column)
            accA = accA + onehot
        work = jnp.where(onehot > 0, -1.0, work)          # mask selected entry
    # accA.T via an identity matmul on the MXU (avoids an explicit small transpose)
    accA_t = lax.dot_general(eye, accA, (((1,), (1,)), ((), ())), preferred_element_type=f32)
    adj = ((accA + accA_t) > 0).astype(f32)               # symmetric adjacency (A + A.T > 0)
    adj_ref[...] = adj

    # ---- Stage 4: two dense SAGEConv layers (mean aggregation) + classifier softmax
    deg = jnp.sum(adj, axis=1, keepdims=True)
    inv_deg = 1.0 / jnp.maximum(deg, 1.0)
    agg1 = jnp.dot(adj, x3, preferred_element_type=f32) * inv_deg
    h = jnp.dot(agg1, wl1_ref[...], preferred_element_type=f32) + bl1_ref[...] \
        + jnp.dot(x3, wr1_ref[...], preferred_element_type=f32)
    h = jnp.maximum(h, 0.0)
    # (dropout: identity in eval mode)
    agg2 = jnp.dot(adj, h, preferred_element_type=f32) * inv_deg
    out = jnp.dot(agg2, wl2_ref[...], preferred_element_type=f32) + bl2_ref[...] \
        + jnp.dot(h, wr2_ref[...], preferred_element_type=f32)
    out_ref[...] = out

    logits = jnp.dot(out, wlin_ref[...], preferred_element_type=f32) + blin_ref[...]
    mx = jnp.max(logits, axis=1, keepdims=True)
    p = jnp.exp(logits - mx)
    probs_ref[...] = p / jnp.sum(p, axis=1, keepdims=True)


@jax.jit
def gnn_forward(x, y, params):
    """x: (60, N, 5) float32 (same layout as the torch input, pre-permute).
       y: (N, L) float32 label matrix. Returns (probs, x, out, adjacency)."""
    (wemb, fc_w, fc_b, fc2_w, fc2_b,
     l1l_w, l1l_b, l1r_w, l2l_w, l2l_b, l2r_w, lin_w, lin_b) = params
    F_, N, C = x.shape

    # Layout plumbing (pure XLA, outside the kernel): 2-D lane-friendly operands.
    xc = jnp.transpose(x, (2, 1, 0)).astype(jnp.float32)                  # (5, N, 60)
    wfc_t = fc_w.T                                                        # (60, 20)
    bfc = fc_b.reshape(1, NEW_FEATURES)
    wfc2_stack = jnp.transpose(fc2_w.reshape(HIDDEN, NEW_FEATURES, EMB_SIZE),
                               (2, 1, 0))                                 # (5, 20, 10)
    bfc2 = fc2_b.reshape(1, HIDDEN)
    wl1, wr1, bl1 = l1l_w.T, l1r_w.T, l1l_b.reshape(1, HIDDEN_CH)
    wl2, wr2, bl2 = l2l_w.T, l2r_w.T, l2l_b.reshape(1, HIDDEN)
    wlin, blin = lin_w.T, lin_b.reshape(1, NUM_CLASSES)

    vmem = pl.BlockSpec(memory_space=pltpu.MemorySpace.VMEM)
    smem = pl.BlockSpec(memory_space=pltpu.MemorySpace.SMEM)

    probs, x3, out, adj = pl.pallas_call(
        gnn_kernel,
        out_shape=(
            jax.ShapeDtypeStruct((N, NUM_CLASSES), jnp.float32),
            jax.ShapeDtypeStruct((N, HIDDEN), jnp.float32),
            jax.ShapeDtypeStruct((N, HIDDEN), jnp.float32),
            jax.ShapeDtypeStruct((N, N), jnp.float32),
        ),
        in_specs=[vmem, vmem, smem,            # xc, y, wemb (scalars -> SMEM)
                  vmem, vmem, vmem, vmem,      # wfc_t, bfc, wfc2_stack, bfc2
                  vmem, vmem, vmem,            # wl1, wr1, bl1
                  vmem, vmem, vmem,            # wl2, wr2, bl2
                  vmem, vmem],                 # wlin, blin
        out_specs=(vmem, vmem, vmem, vmem),
    )(xc, y.astype(jnp.float32), wemb,
      wfc_t, bfc, wfc2_stack, bfc2,
      wl1, wr1, bl1, wl2, wr2, bl2, wlin, blin)
    return probs, x3, out, adj


def init_params(key):
    """Deterministic init mimicking nn.Linear / nn.Embedding defaults (PyTorch layout)."""
    ks = jax.random.split(key, 13)

    def lin(kw, kb, fan_out, fan_in):
        b = 1.0 / jnp.sqrt(float(fan_in))
        w = jax.random.uniform(kw, (fan_out, fan_in), jnp.float32, -b, b)
        bias = jax.random.uniform(kb, (fan_out,), jnp.float32, -b, b)
        return w, bias

    wemb = jax.random.normal(ks[0], (N_CODES, EMB_SIZE), jnp.float32)
    fc_w, fc_b = lin(ks[1], ks[2], NEW_FEATURES, NUM_FEATURES)
    fc2_w, fc2_b = lin(ks[3], ks[4], HIDDEN, NEW_FEATURES * EMB_SIZE)
    l1l_w, l1l_b = lin(ks[5], ks[6], HIDDEN_CH, HIDDEN)
    b1 = 1.0 / jnp.sqrt(float(HIDDEN))
    l1r_w = jax.random.uniform(ks[7], (HIDDEN_CH, HIDDEN), jnp.float32, -b1, b1)
    l2l_w, l2l_b = lin(ks[8], ks[9], HIDDEN, HIDDEN_CH)
    b2 = 1.0 / jnp.sqrt(float(HIDDEN_CH))
    l2r_w = jax.random.uniform(ks[10], (HIDDEN, HIDDEN_CH), jnp.float32, -b2, b2)
    lin_w, lin_b = lin(ks[11], ks[12], NUM_CLASSES, HIDDEN)
    return (wemb, fc_w, fc_b, fc2_w, fc2_b,
            l1l_w, l1l_b, l1r_w, l2l_w, l2l_b, l2r_w, lin_w, lin_b)


def gnn_ref(x, y, params):
    """Pure-JAX reference mirroring the PyTorch forward (eval mode)."""
    (wemb, fc_w, fc_b, fc2_w, fc2_b,
     l1l_w, l1l_b, l1r_w, l2l_w, l2l_b, l2r_w, lin_w, lin_b) = params
    xp = jnp.transpose(x, (1, 0, 2))                                  # (N, 60, 5)
    h = jax.nn.relu(jnp.einsum("nfc,ce->nfe", xp, wemb))              # (x*emb_weight).sum(2).relu()
    h = jnp.transpose(h, (0, 2, 1))                                   # (N, 5, 60)
    h = jax.nn.relu(jnp.einsum("nef,gf->neg", h, fc_w) + fc_b)        # fc + relu
    h = jnp.transpose(h, (0, 2, 1)).reshape(h.shape[0], -1)           # (N, 100)
    x3 = jax.nn.relu(h @ fc2_w.T + fc2_b)                             # (N, 10)

    label = y @ y.T
    label = jnp.where(label > 0, jnp.ones_like(label), label)
    a = x3 @ x3.T
    nrm = jnp.maximum(jnp.linalg.norm(x3, axis=1), 1e-12).reshape(1, -1)
    a = a / nrm / nrm.T
    a = a * label
    # top-6 indices with lowest-index tie-break (stable descending sort), drop the self pick
    order = jnp.argsort(-a, axis=1)
    top5 = order[:, 1:TOPK]
    N = x3.shape[0]
    A = jnp.sum(jnp.eye(N, dtype=jnp.float32)[top5], axis=1)
    A = A + A.T
    adj = (A > 0).astype(jnp.float32)

    deg = jnp.maximum(adj.sum(axis=1, keepdims=True), 1.0)
    agg1 = (adj @ x3) / deg
    h1 = jax.nn.relu(agg1 @ l1l_w.T + l1l_b + x3 @ l1r_w.T)
    agg2 = (adj @ h1) / deg
    out = agg2 @ l2l_w.T + l2l_b + h1 @ l2r_w.T
    probs = jax.nn.softmax(out @ lin_w.T + lin_b, axis=1)
    return probs, x3, out, adj


if __name__ == "__main__":
    N_NODES = 8                       # topk(6) requires at least 6 nodes
    key = jax.random.PRNGKey(0)
    kx, kp = jax.random.split(key)

    x = jax.random.uniform(kx, (NUM_FEATURES, N_NODES, N_CODES), jnp.float32)
    labels = jnp.arange(N_NODES) % NUM_CLASSES
    y = jax.nn.one_hot(labels, NUM_CLASSES, dtype=jnp.float32)        # (N, 3)
    params = init_params(kp)

    probs, x3, out, adj = gnn_forward(x, y, params)
    jax.block_until_ready((probs, x3, out, adj))

    r_probs, r_x3, r_out, r_adj = gnn_ref(x, y, params)
    assert probs.shape == (N_NODES, NUM_CLASSES)
    assert x3.shape == (N_NODES, HIDDEN)
    assert out.shape == (N_NODES, HIDDEN)
    assert adj.shape == (N_NODES, N_NODES)
    assert jnp.array_equal(adj, r_adj)
    assert jnp.allclose(x3, r_x3, atol=1e-4, rtol=1e-4)
    assert jnp.allclose(out, r_out, atol=1e-4, rtol=1e-4)
    assert jnp.allclose(probs, r_probs, atol=1e-4, rtol=1e-4)

    print("KERNEL_OK")
</pallas_src>

<mosaic_0001>
module attributes {stable_mosaic.version = 11 : i64} {
  func.func @gnn_kernel(%arg0: memref<5x8x60xf32, #tpu.memory_space<vmem>>, %arg1: memref<8x3xf32, #tpu.memory_space<vmem>>, %arg2: memref<5x5xf32, #tpu.memory_space<smem>>, %arg3: memref<60x20xf32, #tpu.memory_space<vmem>>, %arg4: memref<1x20xf32, #tpu.memory_space<vmem>>, %arg5: memref<5x20x10xf32, #tpu.memory_space<vmem>>, %arg6: memref<1x10xf32, #tpu.memory_space<vmem>>, %arg7: memref<10x15xf32, #tpu.memory_space<vmem>>, %arg8: memref<10x15xf32, #tpu.memory_space<vmem>>, %arg9: memref<1x15xf32, #tpu.memory_space<vmem>>, %arg10: memref<15x10xf32, #tpu.memory_space<vmem>>, %arg11: memref<15x10xf32, #tpu.memory_space<vmem>>, %arg12: memref<1x10xf32, #tpu.memory_space<vmem>>, %arg13: memref<10x3xf32, #tpu.memory_space<vmem>>, %arg14: memref<1x3xf32, #tpu.memory_space<vmem>>, %arg15: memref<8x3xf32, #tpu.memory_space<vmem>>, %arg16: memref<8x10xf32, #tpu.memory_space<vmem>>, %arg17: memref<8x10xf32, #tpu.memory_space<vmem>>, %arg18: memref<8x8xf32, #tpu.memory_space<vmem>>) attributes {dimension_semantics = [], scalar_prefetch = 0 : i64, scratch_operands = 0 : i64, tpu.core_type = #tpu.core_type<tc>} {
    %cst = arith.constant 0.000000e+00 : f32
    %0 = vector.broadcast %cst : f32 to vector<8x10xf32>
    %c0 = arith.constant 0 : index
    %c0_0 = arith.constant 0 : index
    %1 = memref.load %arg2[%c0, %c0_0] : memref<5x5xf32, #tpu.memory_space<smem>>
    %c0_1 = arith.constant 0 : index
    %c0_2 = arith.constant 0 : index
    %c0_3 = arith.constant 0 : index
    %2 = vector.load %arg0[%c0_1, %c0_2, %c0_3] : memref<5x8x60xf32, #tpu.memory_space<vmem>>, vector<1x8x60xf32>
    %3 = vector.shape_cast %2 : vector<1x8x60xf32> to vector<8x60xf32>
    %4 = vector.broadcast %1 : f32 to vector<8x60xf32>
    %5 = arith.mulf %4, %3 : vector<8x60xf32>
    %c1 = arith.constant 1 : index
    %c0_4 = arith.constant 0 : index
    %6 = memref.load %arg2[%c1, %c0_4] : memref<5x5xf32, #tpu.memory_space<smem>>
    %c1_5 = arith.constant 1 : index
    %c0_6 = arith.constant 0 : index
    %c0_7 = arith.constant 0 : index
    %7 = vector.load %arg0[%c1_5, %c0_6, %c0_7] : memref<5x8x60xf32, #tpu.memory_space<vmem>>, vector<1x8x60xf32>
    %8 = vector.shape_cast %7 : vector<1x8x60xf32> to vector<8x60xf32>
    %9 = vector.broadcast %6 : f32 to vector<8x60xf32>
    %10 = arith.mulf %9, %8 : vector<8x60xf32>
    %11 = arith.addf %5, %10 : vector<8x60xf32>
    %c2 = arith.constant 2 : index
    %c0_8 = arith.constant 0 : index
    %12 = memref.load %arg2[%c2, %c0_8] : memref<5x5xf32, #tpu.memory_space<smem>>
    %c2_9 = arith.constant 2 : index
    %c0_10 = arith.constant 0 : index
    %c0_11 = arith.constant 0 : index
    %13 = vector.load %arg0[%c2_9, %c0_10, %c0_11] : memref<5x8x60xf32, #tpu.memory_space<vmem>>, vector<1x8x60xf32>
    %14 = vector.shape_cast %13 : vector<1x8x60xf32> to vector<8x60xf32>
    %15 = vector.broadcast %12 : f32 to vector<8x60xf32>
    %16 = arith.mulf %15, %14 : vector<8x60xf32>
    %17 = arith.addf %11, %16 : vector<8x60xf32>
    %c3 = arith.constant 3 : index
    %c0_12 = arith.constant 0 : index
    %18 = memref.load %arg2[%c3, %c0_12] : memref<5x5xf32, #tpu.memory_space<smem>>
    %c3_13 = arith.constant 3 : index
    %c0_14 = arith.constant 0 : index
    %c0_15 = arith.constant 0 : index
    %19 = vector.load %arg0[%c3_13, %c0_14, %c0_15] : memref<5x8x60xf32, #tpu.memory_space<vmem>>, vector<1x8x60xf32>
    %20 = vector.shape_cast %19 : vector<1x8x60xf32> to vector<8x60xf32>
    %21 = vector.broadcast %18 : f32 to vector<8x60xf32>
    %22 = arith.mulf %21, %20 : vector<8x60xf32>
    %23 = arith.addf %17, %22 : vector<8x60xf32>
    %c4 = arith.constant 4 : index
    %c0_16 = arith.constant 0 : index
    %24 = memref.load %arg2[%c4, %c0_16] : memref<5x5xf32, #tpu.memory_space<smem>>
    %c4_17 = arith.constant 4 : index
    %c0_18 = arith.constant 0 : index
    %c0_19 = arith.constant 0 : index
    %25 = vector.load %arg0[%c4_17, %c0_18, %c0_19] : memref<5x8x60xf32, #tpu.memory_space<vmem>>, vector<1x8x60xf32>
    %26 = vector.shape_cast %25 : vector<1x8x60xf32> to vector<8x60xf32>
    %27 = vector.broadcast %24 : f32 to vector<8x60xf32>
    %28 = arith.mulf %27, %26 : vector<8x60xf32>
    %29 = arith.addf %23, %28 : vector<8x60xf32>
    %cst_20 = arith.constant 0.000000e+00 : f32
    %30 = vector.broadcast %cst_20 : f32 to vector<8x60xf32>
    %31 = arith.maximumf %29, %30 : vector<8x60xf32>
    %c0_21 = arith.constant 0 : index
    %c0_22 = arith.constant 0 : index
    %32 = vector.load %arg3[%c0_21, %c0_22] : memref<60x20xf32, #tpu.memory_space<vmem>>, vector<60x20xf32>
    %cst_23 = arith.constant dense<0.000000e+00> : vector<8x20xf32>
    %33 = tpu.matmul %31, %32, %cst_23 {dimension_numbers = #tpu.dot_dimension_numbers<[1], [0], [0], [1], [0, 0, 1, 1], [], []>} : vector<8x60xf32>, vector<60x20xf32>, vector<8x20xf32> -> vector<8x20xf32>
    %c0_24 = arith.constant 0 : index
    %c0_25 = arith.constant 0 : index
    %34 = vector.load %arg4[%c0_24, %c0_25] : memref<1x20xf32, #tpu.memory_space<vmem>>, vector<1x20xf32>
    %35 = vector.broadcast %34 : vector<1x20xf32> to vector<8x20xf32>
    %36 = arith.addf %33, %35 : vector<8x20xf32>
    %cst_26 = arith.constant 0.000000e+00 : f32
    %37 = vector.broadcast %cst_26 : f32 to vector<8x20xf32>
    %38 = arith.maximumf %36, %37 : vector<8x20xf32>
    %c0_27 = arith.constant 0 : index
    %c0_28 = arith.constant 0 : index
    %c0_29 = arith.constant 0 : index
    %39 = vector.load %arg5[%c0_27, %c0_28, %c0_29] : memref<5x20x10xf32, #tpu.memory_space<vmem>>, vector<1x20x10xf32>
    %40 = vector.shape_cast %39 : vector<1x20x10xf32> to vector<20x10xf32>
    %cst_30 = arith.constant dense<0.000000e+00> : vector<8x10xf32>
    %41 = tpu.matmul %38, %40, %cst_30 {dimension_numbers = #tpu.dot_dimension_numbers<[1], [0], [0], [1], [0, 0, 1, 1], [], []>} : vector<8x20xf32>, vector<20x10xf32>, vector<8x10xf32> -> vector<8x10xf32>
    %42 = arith.addf %0, %41 : vector<8x10xf32>
    %c0_31 = arith.constant 0 : index
    %c1_32 = arith.constant 1 : index
    %43 = memref.load %arg2[%c0_31, %c1_32] : memref<5x5xf32, #tpu.memory_space<smem>>
    %c0_33 = arith.constant 0 : index
    %c0_34 = arith.constant 0 : index
    %c0_35 = arith.constant 0 : index
    %44 = vector.load %arg0[%c0_33, %c0_34, %c0_35] : memref<5x8x60xf32, #tpu.memory_space<vmem>>, vector<1x8x60xf32>
    %45 = vector.shape_cast %44 : vector<1x8x60xf32> to vector<8x60xf32>
    %46 = vector.broadcast %43 : f32 to vector<8x60xf32>
    %47 = arith.mulf %46, %45 : vector<8x60xf32>
    %c1_36 = arith.constant 1 : index
    %c1_37 = arith.constant 1 : index
    %48 = memref.load %arg2[%c1_36, %c1_37] : memref<5x5xf32, #tpu.memory_space<smem>>
    %c1_38 = arith.constant 1 : index
    %c0_39 = arith.constant 0 : index
    %c0_40 = arith.constant 0 : index
    %49 = vector.load %arg0[%c1_38, %c0_39, %c0_40] : memref<5x8x60xf32, #tpu.memory_space<vmem>>, vector<1x8x60xf32>
    %50 = vector.shape_cast %49 : vector<1x8x60xf32> to vector<8x60xf32>
    %51 = vector.broadcast %48 : f32 to vector<8x60xf32>
    %52 = arith.mulf %51, %50 : vector<8x60xf32>
    %53 = arith.addf %47, %52 : vector<8x60xf32>
    %c2_41 = arith.constant 2 : index
    %c1_42 = arith.constant 1 : index
    %54 = memref.load %arg2[%c2_41, %c1_42] : memref<5x5xf32, #tpu.memory_space<smem>>
    %c2_43 = arith.constant 2 : index
    %c0_44 = arith.constant 0 : index
    %c0_45 = arith.constant 0 : index
    %55 = vector.load %arg0[%c2_43, %c0_44, %c0_45] : memref<5x8x60xf32, #tpu.memory_space<vmem>>, vector<1x8x60xf32>
    %56 = vector.shape_cast %55 : vector<1x8x60xf32> to vector<8x60xf32>
    %57 = vector.broadcast %54 : f32 to vector<8x60xf32>
    %58 = arith.mulf %57, %56 : vector<8x60xf32>
    %59 = arith.addf %53, %58 : vector<8x60xf32>
    %c3_46 = arith.constant 3 : index
    %c1_47 = arith.constant 1 : index
    %60 = memref.load %arg2[%c3_46, %c1_47] : memref<5x5xf32, #tpu.memory_space<smem>>
    %c3_48 = arith.constant 3 : index
    %c0_49 = arith.constant 0 : index
    %c0_50 = arith.constant 0 : index
    %61 = vector.load %arg0[%c3_48, %c0_49, %c0_50] : memref<5x8x60xf32, #tpu.memory_space<vmem>>, vector<1x8x60xf32>
    %62 = vector.shape_cast %61 : vector<1x8x60xf32> to vector<8x60xf32>
    %63 = vector.broadcast %60 : f32 to vector<8x60xf32>
    %64 = arith.mulf %63, %62 : vector<8x60xf32>
    %65 = arith.addf %59, %64 : vector<8x60xf32>
    %c4_51 = arith.constant 4 : index
    %c1_52 = arith.constant 1 : index
    %66 = memref.load %arg2[%c4_51, %c1_52] : memref<5x5xf32, #tpu.memory_space<smem>>
    %c4_53 = arith.constant 4 : index
    %c0_54 = arith.constant 0 : index
    %c0_55 = arith.constant 0 : index
    %67 = vector.load %arg0[%c4_53, %c0_54, %c0_55] : memref<5x8x60xf32, #tpu.memory_space<vmem>>, vector<1x8x60xf32>
    %68 = vector.shape_cast %67 : vector<1x8x60xf32> to vector<8x60xf32>
    %69 = vector.broadcast %66 : f32 to vector<8x60xf32>
    %70 = arith.mulf %69, %68 : vector<8x60xf32>
    %71 = arith.addf %65, %70 : vector<8x60xf32>
    %cst_56 = arith.constant 0.000000e+00 : f32
    %72 = vector.broadcast %cst_56 : f32 to vector<8x60xf32>
    %73 = arith.maximumf %71, %72 : vector<8x60xf32>
    %c0_57 = arith.constant 0 : index
    %c0_58 = arith.constant 0 : index
    %74 = vector.load %arg3[%c0_57, %c0_58] : memref<60x20xf32, #tpu.memory_space<vmem>>, vector<60x20xf32>
    %cst_59 = arith.constant dense<0.000000e+00> : vector<8x20xf32>
    %75 = tpu.matmul %73, %74, %cst_59 {dimension_numbers = #tpu.dot_dimension_numbers<[1], [0], [0], [1], [0, 0, 1, 1], [], []>} : vector<8x60xf32>, vector<60x20xf32>, vector<8x20xf32> -> vector<8x20xf32>
    %c0_60 = arith.constant 0 : index
    %c0_61 = arith.constant 0 : index
    %76 = vector.load %arg4[%c0_60, %c0_61] : memref<1x20xf32, #tpu.memory_space<vmem>>, vector<1x20xf32>
    %77 = vector.broadcast %76 : vector<1x20xf32> to vector<8x20xf32>
    %78 = arith.addf %75, %77 : vector<8x20xf32>
    %cst_62 = arith.constant 0.000000e+00 : f32
    %79 = vector.broadcast %cst_62 : f32 to vector<8x20xf32>
    %80 = arith.maximumf %78, %79 : vector<8x20xf32>
    %c1_63 = arith.constant 1 : index
    %c0_64 = arith.constant 0 : index
    %c0_65 = arith.constant 0 : index
    %81 = vector.load %arg5[%c1_63, %c0_64, %c0_65] : memref<5x20x10xf32, #tpu.memory_space<vmem>>, vector<1x20x10xf32>
    %82 = vector.shape_cast %81 : vector<1x20x10xf32> to vector<20x10xf32>
    %cst_66 = arith.constant dense<0.000000e+00> : vector<8x10xf32>
    %83 = tpu.matmul %80, %82, %cst_66 {dimension_numbers = #tpu.dot_dimension_numbers<[1], [0], [0], [1], [0, 0, 1, 1], [], []>} : vector<8x20xf32>, vector<20x10xf32>, vector<8x10xf32> -> vector<8x10xf32>
    %84 = arith.addf %42, %83 : vector<8x10xf32>
    %c0_67 = arith.constant 0 : index
    %c2_68 = arith.constant 2 : index
    %85 = memref.load %arg2[%c0_67, %c2_68] : memref<5x5xf32, #tpu.memory_space<smem>>
    %c0_69 = arith.constant 0 : index
    %c0_70 = arith.constant 0 : index
    %c0_71 = arith.constant 0 : index
    %86 = vector.load %arg0[%c0_69, %c0_70, %c0_71] : memref<5x8x60xf32, #tpu.memory_space<vmem>>, vector<1x8x60xf32>
    %87 = vector.shape_cast %86 : vector<1x8x60xf32> to vector<8x60xf32>
    %88 = vector.broadcast %85 : f32 to vector<8x60xf32>
    %89 = arith.mulf %88, %87 : vector<8x60xf32>
    %c1_72 = arith.constant 1 : index
    %c2_73 = arith.constant 2 : index
    %90 = memref.load %arg2[%c1_72, %c2_73] : memref<5x5xf32, #tpu.memory_space<smem>>
    %c1_74 = arith.constant 1 : index
    %c0_75 = arith.constant 0 : index
    %c0_76 = arith.constant 0 : index
    %91 = vector.load %arg0[%c1_74, %c0_75, %c0_76] : memref<5x8x60xf32, #tpu.memory_space<vmem>>, vector<1x8x60xf32>
    %92 = vector.shape_cast %91 : vector<1x8x60xf32> to vector<8x60xf32>
    %93 = vector.broadcast %90 : f32 to vector<8x60xf32>
    %94 = arith.mulf %93, %92 : vector<8x60xf32>
    %95 = arith.addf %89, %94 : vector<8x60xf32>
    %c2_77 = arith.constant 2 : index
    %c2_78 = arith.constant 2 : index
    %96 = memref.load %arg2[%c2_77, %c2_78] : memref<5x5xf32, #tpu.memory_space<smem>>
    %c2_79 = arith.constant 2 : index
    %c0_80 = arith.constant 0 : index
    %c0_81 = arith.constant 0 : index
    %97 = vector.load %arg0[%c2_79, %c0_80, %c0_81] : memref<5x8x60xf32, #tpu.memory_space<vmem>>, vector<1x8x60xf32>
    %98 = vector.shape_cast %97 : vector<1x8x60xf32> to vector<8x60xf32>
    %99 = vector.broadcast %96 : f32 to vector<8x60xf32>
    %100 = arith.mulf %99, %98 : vector<8x60xf32>
    %101 = arith.addf %95, %100 : vector<8x60xf32>
    %c3_82 = arith.constant 3 : index
    %c2_83 = arith.constant 2 : index
    %102 = memref.load %arg2[%c3_82, %c2_83] : memref<5x5xf32, #tpu.memory_space<smem>>
    %c3_84 = arith.constant 3 : index
    %c0_85 = arith.constant 0 : index
    %c0_86 = arith.constant 0 : index
    %103 = vector.load %arg0[%c3_84, %c0_85, %c0_86] : memref<5x8x60xf32, #tpu.memory_space<vmem>>, vector<1x8x60xf32>
    %104 = vector.shape_cast %103 : vector<1x8x60xf32> to vector<8x60xf32>
    %105 = vector.broadcast %102 : f32 to vector<8x60xf32>
    %106 = arith.mulf %105, %104 : vector<8x60xf32>
    %107 = arith.addf %101, %106 : vector<8x60xf32>
    %c4_87 = arith.constant 4 : index
    %c2_88 = arith.constant 2 : index
    %108 = memref.load %arg2[%c4_87, %c2_88] : memref<5x5xf32, #tpu.memory_space<smem>>
    %c4_89 = arith.constant 4 : index
    %c0_90 = arith.constant 0 : index
    %c0_91 = arith.constant 0 : index
    %109 = vector.load %arg0[%c4_89, %c0_90, %c0_91] : memref<5x8x60xf32, #tpu.memory_space<vmem>>, vector<1x8x60xf32>
    %110 = vector.shape_cast %109 : vector<1x8x60xf32> to vector<8x60xf32>
    %111 = vector.broadcast %108 : f32 to vector<8x60xf32>
    %112 = arith.mulf %111, %110 : vector<8x60xf32>
    %113 = arith.addf %107, %112 : vector<8x60xf32>
    %cst_92 = arith.constant 0.000000e+00 : f32
    %114 = vector.broadcast %cst_92 : f32 to vector<8x60xf32>
    %115 = arith.maximumf %113, %114 : vector<8x60xf32>
    %c0_93 = arith.constant 0 : index
    %c0_94 = arith.constant 0 : index
    %116 = vector.load %arg3[%c0_93, %c0_94] : memref<60x20xf32, #tpu.memory_space<vmem>>, vector<60x20xf32>
    %cst_95 = arith.constant dense<0.000000e+00> : vector<8x20xf32>
    %117 = tpu.matmul %115, %116, %cst_95 {dimension_numbers = #tpu.dot_dimension_numbers<[1], [0], [0], [1], [0, 0, 1, 1], [], []>} : vector<8x60xf32>, vector<60x20xf32>, vector<8x20xf32> -> vector<8x20xf32>
    %c0_96 = arith.constant 0 : index
    %c0_97 = arith.constant 0 : index
    %118 = vector.load %arg4[%c0_96, %c0_97] : memref<1x20xf32, #tpu.memory_space<vmem>>, vector<1x20xf32>
    %119 = vector.broadcast %118 : vector<1x20xf32> to vector<8x20xf32>
    %120 = arith.addf %117, %119 : vector<8x20xf32>
    %cst_98 = arith.constant 0.000000e+00 : f32
    %121 = vector.broadcast %cst_98 : f32 to vector<8x20xf32>
    %122 = arith.maximumf %120, %121 : vector<8x20xf32>
    %c2_99 = arith.constant 2 : index
    %c0_100 = arith.constant 0 : index
    %c0_101 = arith.constant 0 : index
    %123 = vector.load %arg5[%c2_99, %c0_100, %c0_101] : memref<5x20x10xf32, #tpu.memory_space<vmem>>, vector<1x20x10xf32>
    %124 = vector.shape_cast %123 : vector<1x20x10xf32> to vector<20x10xf32>
    %cst_102 = arith.constant dense<0.000000e+00> : vector<8x10xf32>
    %125 = tpu.matmul %122, %124, %cst_102 {dimension_numbers = #tpu.dot_dimension_numbers<[1], [0], [0], [1], [0, 0, 1, 1], [], []>} : vector<8x20xf32>, vector<20x10xf32>, vector<8x10xf32> -> vector<8x10xf32>
    %126 = arith.addf %84, %125 : vector<8x10xf32>
    %c0_103 = arith.constant 0 : index
    %c3_104 = arith.constant 3 : index
    %127 = memref.load %arg2[%c0_103, %c3_104] : memref<5x5xf32, #tpu.memory_space<smem>>
    %c0_105 = arith.constant 0 : index
    %c0_106 = arith.constant 0 : index
    %c0_107 = arith.constant 0 : index
    %128 = vector.load %arg0[%c0_105, %c0_106, %c0_107] : memref<5x8x60xf32, #tpu.memory_space<vmem>>, vector<1x8x60xf32>
    %129 = vector.shape_cast %128 : vector<1x8x60xf32> to vector<8x60xf32>
    %130 = vector.broadcast %127 : f32 to vector<8x60xf32>
    %131 = arith.mulf %130, %129 : vector<8x60xf32>
    %c1_108 = arith.constant 1 : index
    %c3_109 = arith.constant 3 : index
    %132 = memref.load %arg2[%c1_108, %c3_109] : memref<5x5xf32, #tpu.memory_space<smem>>
    %c1_110 = arith.constant 1 : index
    %c0_111 = arith.constant 0 : index
    %c0_112 = arith.constant 0 : index
    %133 = vector.load %arg0[%c1_110, %c0_111, %c0_112] : memref<5x8x60xf32, #tpu.memory_space<vmem>>, vector<1x8x60xf32>
    %134 = vector.shape_cast %133 : vector<1x8x60xf32> to vector<8x60xf32>
    %135 = vector.broadcast %132 : f32 to vector<8x60xf32>
    %136 = arith.mulf %135, %134 : vector<8x60xf32>
    %137 = arith.addf %131, %136 : vector<8x60xf32>
    %c2_113 = arith.constant 2 : index
    %c3_114 = arith.constant 3 : index
    %138 = memref.load %arg2[%c2_113, %c3_114] : memref<5x5xf32, #tpu.memory_space<smem>>
    %c2_115 = arith.constant 2 : index
    %c0_116 = arith.constant 0 : index
    %c0_117 = arith.constant 0 : index
    %139 = vector.load %arg0[%c2_115, %c0_116, %c0_117] : memref<5x8x60xf32, #tpu.memory_space<vmem>>, vector<1x8x60xf32>
    %140 = vector.shape_cast %139 : vector<1x8x60xf32> to vector<8x60xf32>
    %141 = vector.broadcast %138 : f32 to vector<8x60xf32>
    %142 = arith.mulf %141, %140 : vector<8x60xf32>
    %143 = arith.addf %137, %142 : vector<8x60xf32>
    %c3_118 = arith.constant 3 : index
    %c3_119 = arith.constant 3 : index
    %144 = memref.load %arg2[%c3_118, %c3_119] : memref<5x5xf32, #tpu.memory_space<smem>>
    %c3_120 = arith.constant 3 : index
    %c0_121 = arith.constant 0 : index
    %c0_122 = arith.constant 0 : index
    %145 = vector.load %arg0[%c3_120, %c0_121, %c0_122] : memref<5x8x60xf32, #tpu.memory_space<vmem>>, vector<1x8x60xf32>
    %146 = vector.shape_cast %145 : vector<1x8x60xf32> to vector<8x60xf32>
    %147 = vector.broadcast %144 : f32 to vector<8x60xf32>
    %148 = arith.mulf %147, %146 : vector<8x60xf32>
    %149 = arith.addf %143, %148 : vector<8x60xf32>
    %c4_123 = arith.constant 4 : index
    %c3_124 = arith.constant 3 : index
    %150 = memref.load %arg2[%c4_123, %c3_124] : memref<5x5xf32, #tpu.memory_space<smem>>
    %c4_125 = arith.constant 4 : index
    %c0_126 = arith.constant 0 : index
    %c0_127 = arith.constant 0 : index
    %151 = vector.load %arg0[%c4_125, %c0_126, %c0_127] : memref<5x8x60xf32, #tpu.memory_space<vmem>>, vector<1x8x60xf32>
    %152 = vector.shape_cast %151 : vector<1x8x60xf32> to vector<8x60xf32>
    %153 = vector.broadcast %150 : f32 to vector<8x60xf32>
    %154 = arith.mulf %153, %152 : vector<8x60xf32>
    %155 = arith.addf %149, %154 : vector<8x60xf32>
    %cst_128 = arith.constant 0.000000e+00 : f32
    %156 = vector.broadcast %cst_128 : f32 to vector<8x60xf32>
    %157 = arith.maximumf %155, %156 : vector<8x60xf32>
    %c0_129 = arith.constant 0 : index
    %c0_130 = arith.constant 0 : index
    %158 = vector.load %arg3[%c0_129, %c0_130] : memref<60x20xf32, #tpu.memory_space<vmem>>, vector<60x20xf32>
    %cst_131 = arith.constant dense<0.000000e+00> : vector<8x20xf32>
    %159 = tpu.matmul %157, %158, %cst_131 {dimension_numbers = #tpu.dot_dimension_numbers<[1], [0], [0], [1], [0, 0, 1, 1], [], []>} : vector<8x60xf32>, vector<60x20xf32>, vector<8x20xf32> -> vector<8x20xf32>
    %c0_132 = arith.constant 0 : index
    %c0_133 = arith.constant 0 : index
    %160 = vector.load %arg4[%c0_132, %c0_133] : memref<1x20xf32, #tpu.memory_space<vmem>>, vector<1x20xf32>
    %161 = vector.broadcast %160 : vector<1x20xf32> to vector<8x20xf32>
    %162 = arith.addf %159, %161 : vector<8x20xf32>
    %cst_134 = arith.constant 0.000000e+00 : f32
    %163 = vector.broadcast %cst_134 : f32 to vector<8x20xf32>
    %164 = arith.maximumf %162, %163 : vector<8x20xf32>
    %c3_135 = arith.constant 3 : index
    %c0_136 = arith.constant 0 : index
    %c0_137 = arith.constant 0 : index
    %165 = vector.load %arg5[%c3_135, %c0_136, %c0_137] : memref<5x20x10xf32, #tpu.memory_space<vmem>>, vector<1x20x10xf32>
    %166 = vector.shape_cast %165 : vector<1x20x10xf32> to vector<20x10xf32>
    %cst_138 = arith.constant dense<0.000000e+00> : vector<8x10xf32>
    %167 = tpu.matmul %164, %166, %cst_138 {dimension_numbers = #tpu.dot_dimension_numbers<[1], [0], [0], [1], [0, 0, 1, 1], [], []>} : vector<8x20xf32>, vector<20x10xf32>, vector<8x10xf32> -> vector<8x10xf32>
    %168 = arith.addf %126, %167 : vector<8x10xf32>
    %c0_139 = arith.constant 0 : index
    %c4_140 = arith.constant 4 : index
    %169 = memref.load %arg2[%c0_139, %c4_140] : memref<5x5xf32, #tpu.memory_space<smem>>
    %c0_141 = arith.constant 0 : index
    %c0_142 = arith.constant 0 : index
    %c0_143 = arith.constant 0 : index
    %170 = vector.load %arg0[%c0_141, %c0_142, %c0_143] : memref<5x8x60xf32, #tpu.memory_space<vmem>>, vector<1x8x60xf32>
    %171 = vector.shape_cast %170 : vector<1x8x60xf32> to vector<8x60xf32>
    %172 = vector.broadcast %169 : f32 to vector<8x60xf32>
    %173 = arith.mulf %172, %171 : vector<8x60xf32>
    %c1_144 = arith.constant 1 : index
    %c4_145 = arith.constant 4 : index
    %174 = memref.load %arg2[%c1_144, %c4_145] : memref<5x5xf32, #tpu.memory_space<smem>>
    %c1_146 = arith.constant 1 : index
    %c0_147 = arith.constant 0 : index
    %c0_148 = arith.constant 0 : index
    %175 = vector.load %arg0[%c1_146, %c0_147, %c0_148] : memref<5x8x60xf32, #tpu.memory_space<vmem>>, vector<1x8x60xf32>
    %176 = vector.shape_cast %175 : vector<1x8x60xf32> to vector<8x60xf32>
    %177 = vector.broadcast %174 : f32 to vector<8x60xf32>
    %178 = arith.mulf %177, %176 : vector<8x60xf32>
    %179 = arith.addf %173, %178 : vector<8x60xf32>
    %c2_149 = arith.constant 2 : index
    %c4_150 = arith.constant 4 : index
    %180 = memref.load %arg2[%c2_149, %c4_150] : memref<5x5xf32, #tpu.memory_space<smem>>
    %c2_151 = arith.constant 2 : index
    %c0_152 = arith.constant 0 : index
    %c0_153 = arith.constant 0 : index
    %181 = vector.load %arg0[%c2_151, %c0_152, %c0_153] : memref<5x8x60xf32, #tpu.memory_space<vmem>>, vector<1x8x60xf32>
    %182 = vector.shape_cast %181 : vector<1x8x60xf32> to vector<8x60xf32>
    %183 = vector.broadcast %180 : f32 to vector<8x60xf32>
    %184 = arith.mulf %183, %182 : vector<8x60xf32>
    %185 = arith.addf %179, %184 : vector<8x60xf32>
    %c3_154 = arith.constant 3 : index
    %c4_155 = arith.constant 4 : index
    %186 = memref.load %arg2[%c3_154, %c4_155] : memref<5x5xf32, #tpu.memory_space<smem>>
    %c3_156 = arith.constant 3 : index
    %c0_157 = arith.constant 0 : index
    %c0_158 = arith.constant 0 : index
    %187 = vector.load %arg0[%c3_156, %c0_157, %c0_158] : memref<5x8x60xf32, #tpu.memory_space<vmem>>, vector<1x8x60xf32>
    %188 = vector.shape_cast %187 : vector<1x8x60xf32> to vector<8x60xf32>
    %189 = vector.broadcast %186 : f32 to vector<8x60xf32>
    %190 = arith.mulf %189, %188 : vector<8x60xf32>
    %191 = arith.addf %185, %190 : vector<8x60xf32>
    %c4_159 = arith.constant 4 : index
    %c4_160 = arith.constant 4 : index
    %192 = memref.load %arg2[%c4_159, %c4_160] : memref<5x5xf32, #tpu.memory_space<smem>>
    %c4_161 = arith.constant 4 : index
    %c0_162 = arith.constant 0 : index
    %c0_163 = arith.constant 0 : index
    %193 = vector.load %arg0[%c4_161, %c0_162, %c0_163] : memref<5x8x60xf32, #tpu.memory_space<vmem>>, vector<1x8x60xf32>
    %194 = vector.shape_cast %193 : vector<1x8x60xf32> to vector<8x60xf32>
    %195 = vector.broadcast %192 : f32 to vector<8x60xf32>
    %196 = arith.mulf %195, %194 : vector<8x60xf32>
    %197 = arith.addf %191, %196 : vector<8x60xf32>
    %cst_164 = arith.constant 0.000000e+00 : f32
    %198 = vector.broadcast %cst_164 : f32 to vector<8x60xf32>
    %199 = arith.maximumf %197, %198 : vector<8x60xf32>
    %c0_165 = arith.constant 0 : index
    %c0_166 = arith.constant 0 : index
    %200 = vector.load %arg3[%c0_165, %c0_166] : memref<60x20xf32, #tpu.memory_space<vmem>>, vector<60x20xf32>
    %cst_167 = arith.constant dense<0.000000e+00> : vector<8x20xf32>
    %201 = tpu.matmul %199, %200, %cst_167 {dimension_numbers = #tpu.dot_dimension_numbers<[1], [0], [0], [1], [0, 0, 1, 1], [], []>} : vector<8x60xf32>, vector<60x20xf32>, vector<8x20xf32> -> vector<8x20xf32>
    %c0_168 = arith.constant 0 : index
    %c0_169 = arith.constant 0 : index
    %202 = vector.load %arg4[%c0_168, %c0_169] : memref<1x20xf32, #tpu.memory_space<vmem>>, vector<1x20xf32>
    %203 = vector.broadcast %202 : vector<1x20xf32> to vector<8x20xf32>
    %204 = arith.addf %201, %203 : vector<8x20xf32>
    %cst_170 = arith.constant 0.000000e+00 : f32
    %205 = vector.broadcast %cst_170 : f32 to vector<8x20xf32>
    %206 = arith.maximumf %204, %205 : vector<8x20xf32>
    %c4_171 = arith.constant 4 : index
    %c0_172 = arith.constant 0 : index
    %c0_173 = arith.constant 0 : index
    %207 = vector.load %arg5[%c4_171, %c0_172, %c0_173] : memref<5x20x10xf32, #tpu.memory_space<vmem>>, vector<1x20x10xf32>
    %208 = vector.shape_cast %207 : vector<1x20x10xf32> to vector<20x10xf32>
    %cst_174 = arith.constant dense<0.000000e+00> : vector<8x10xf32>
    %209 = tpu.matmul %206, %208, %cst_174 {dimension_numbers = #tpu.dot_dimension_numbers<[1], [0], [0], [1], [0, 0, 1, 1], [], []>} : vector<8x20xf32>, vector<20x10xf32>, vector<8x10xf32> -> vector<8x10xf32>
    %210 = arith.addf %168, %209 : vector<8x10xf32>
    %c0_175 = arith.constant 0 : index
    %c0_176 = arith.constant 0 : index
    %211 = vector.load %arg6[%c0_175, %c0_176] : memref<1x10xf32, #tpu.memory_space<vmem>>, vector<1x10xf32>
    %212 = vector.broadcast %211 : vector<1x10xf32> to vector<8x10xf32>
    %213 = arith.addf %210, %212 : vector<8x10xf32>
    %cst_177 = arith.constant 0.000000e+00 : f32
    %214 = vector.broadcast %cst_177 : f32 to vector<8x10xf32>
    %215 = arith.maximumf %213, %214 : vector<8x10xf32>
    %c0_178 = arith.constant 0 : index
    %c0_179 = arith.constant 0 : index
    %216 = vector.load %arg16[%c0_178, %c0_179] : memref<8x10xf32, #tpu.memory_space<vmem>>, vector<8x10xf32>
    tpu.vector_store %arg16[%c0_178, %c0_179], %215 {strides = array<i32>} : memref<8x10xf32, #tpu.memory_space<vmem>>, vector<8x10xf32>,
    %c0_180 = arith.constant 0 : index
    %c0_181 = arith.constant 0 : index
    %217 = vector.load %arg1[%c0_180, %c0_181] : memref<8x3xf32, #tpu.memory_space<vmem>>, vector<8x3xf32>
    %cst_182 = arith.constant dense<0.000000e+00> : vector<8x8xf32>
    %218 = tpu.matmul %217, %217, %cst_182 {dimension_numbers = #tpu.dot_dimension_numbers<[1], [1], [0], [0], [0, 0, 1, 0], [], []>} : vector<8x3xf32>, vector<8x3xf32>, vector<8x8xf32> -> vector<8x8xf32>
    %cst_183 = arith.constant 0.000000e+00 : f32
    %219 = vector.broadcast %cst_183 : f32 to vector<8x8xf32>
    %220 = arith.cmpf ogt, %218, %219 : vector<8x8xf32>
    %cst_184 = arith.constant 1.000000e+00 : f32
    %221 = vector.broadcast %cst_184 : f32 to vector<8x8xf32>
    %222 = arith.select %220, %221, %218 : vector<8x8xi1>, vector<8x8xf32>
    %223 = arith.mulf %215, %215 : vector<8x10xf32>
    %cst_185 = arith.constant dense<0.000000e+00> : vector<8xf32>
    %224 = vector.multi_reduction <add>, %223, %cst_185 [1] : vector<8x10xf32> to vector<8xf32>
    %225 = vector.shape_cast %224 : vector<8xf32> to vector<8x1xf32>
    %cst_186 = arith.constant 1.000000e-24 : f32
    %226 = vector.broadcast %cst_186 : f32 to vector<8x1xf32>
    %227 = arith.maximumf %225, %226 : vector<8x1xf32>
    %228 = math.rsqrt %227 : vector<8x1xf32>
    %229 = vector.broadcast %228 : vector<8x1xf32> to vector<8x10xf32>
    %230 = arith.mulf %215, %229 : vector<8x10xf32>
    %cst_187 = arith.constant dense<0.000000e+00> : vector<8x8xf32>
    %231 = tpu.matmul %230, %230, %cst_187 {dimension_numbers = #tpu.dot_dimension_numbers<[1], [1], [0], [0], [0, 0, 1, 0], [], []>} : vector<8x10xf32>, vector<8x10xf32>, vector<8x8xf32> -> vector<8x8xf32>
    %232 = arith.mulf %231, %222 : vector<8x8xf32>
    %233 = tpu.iota {dimensions = array<i32: 1>} : vector<8x8xi32>
    %234 = tpu.iota {dimensions = array<i32: 0>} : vector<8x8xi32>
    %235 = arith.cmpi eq, %234, %233 : vector<8x8xi32>
    %236 = arith.extui %235 : vector<8x8xi1> to vector<8x8xi32>
    %237 = arith.sitofp %236 : vector<8x8xi32> to vector<8x8xf32>
    %238 = arith.sitofp %233 : vector<8x8xi32> to vector<8x8xf32>
    %cst_188 = arith.constant 0.000000e+00 : f32
    %239 = vector.broadcast %cst_188 : f32 to vector<8x8xf32>
    %cst_189 = arith.constant dense<0xFF800000> : vector<8xf32>
    %240 = vector.multi_reduction <maximumf>, %232, %cst_189 [1] : vector<8x8xf32> to vector<8xf32>
    %241 = vector.shape_cast %240 : vector<8xf32> to vector<8x1xf32>
    %242 = vector.broadcast %241 : vector<8x1xf32> to vector<8x8xf32>
    %243 = arith.cmpf oeq, %232, %242 : vector<8x8xf32>
    %cst_190 = arith.constant 8.000000e+00 : f32
    %244 = vector.broadcast %cst_190 : f32 to vector<8x8xf32>
    %245 = arith.select %243, %238, %244 : vector<8x8xi1>, vector<8x8xf32>
    %cst_191 = arith.constant dense<0x7F800000> : vector<8xf32>
    %246 = vector.multi_reduction <minimumf>, %245, %cst_191 [1] : vector<8x8xf32> to vector<8xf32>
    %247 = vector.shape_cast %246 : vector<8xf32> to vector<8x1xf32>
    %248 = vector.broadcast %247 : vector<8x1xf32> to vector<8x8xf32>
    %249 = arith.cmpf oeq, %238, %248 : vector<8x8xf32>
    %250 = arith.extui %249 : vector<8x8xi1> to vector<8x8xi32>
    %251 = arith.sitofp %250 : vector<8x8xi32> to vector<8x8xf32>
    %cst_192 = arith.constant 0.000000e+00 : f32
    %252 = vector.broadcast %cst_192 : f32 to vector<8x8xf32>
    %253 = arith.cmpf ogt, %251, %252 : vector<8x8xf32>
    %cst_193 = arith.constant -1.000000e+00 : f32
    %254 = vector.broadcast %cst_193 : f32 to vector<8x8xf32>
    %255 = arith.select %253, %254, %232 : vector<8x8xi1>, vector<8x8xf32>
    %cst_194 = arith.constant dense<0xFF800000> : vector<8xf32>
    %256 = vector.multi_reduction <maximumf>, %255, %cst_194 [1] : vector<8x8xf32> to vector<8xf32>
    %257 = vector.shape_cast %256 : vector<8xf32> to vector<8x1xf32>
    %258 = vector.broadcast %257 : vector<8x1xf32> to vector<8x8xf32>
    %259 = arith.cmpf oeq, %255, %258 : vector<8x8xf32>
    %cst_195 = arith.constant 8.000000e+00 : f32
    %260 = vector.broadcast %cst_195 : f32 to vector<8x8xf32>
    %261 = arith.select %259, %238, %260 : vector<8x8xi1>, vector<8x8xf32>
    %cst_196 = arith.constant dense<0x7F800000> : vector<8xf32>
    %262 = vector.multi_reduction <minimumf>, %261, %cst_196 [1] : vector<8x8xf32> to vector<8xf32>
    %263 = vector.shape_cast %262 : vector<8xf32> to vector<8x1xf32>
    %264 = vector.broadcast %263 : vector<8x1xf32> to vector<8x8xf32>
    %265 = arith.cmpf oeq, %238, %264 : vector<8x8xf32>
    %266 = arith.extui %265 : vector<8x8xi1> to vector<8x8xi32>
    %267 = arith.sitofp %266 : vector<8x8xi32> to vector<8x8xf32>
    %268 = arith.addf %239, %267 : vector<8x8xf32>
    %cst_197 = arith.constant 0.000000e+00 : f32
    %269 = vector.broadcast %cst_197 : f32 to vector<8x8xf32>
    %270 = arith.cmpf ogt, %267, %269 : vector<8x8xf32>
    %cst_198 = arith.constant -1.000000e+00 : f32
    %271 = vector.broadcast %cst_198 : f32 to vector<8x8xf32>
    %272 = arith.select %270, %271, %255 : vector<8x8xi1>, vector<8x8xf32>
    %cst_199 = arith.constant dense<0xFF800000> : vector<8xf32>
    %273 = vector.multi_reduction <maximumf>, %272, %cst_199 [1] : vector<8x8xf32> to vector<8xf32>
    %274 = vector.shape_cast %273 : vector<8xf32> to vector<8x1xf32>
    %275 = vector.broadcast %274 : vector<8x1xf32> to vector<8x8xf32>
    %276 = arith.cmpf oeq, %272, %275 : vector<8x8xf32>
    %cst_200 = arith.constant 8.000000e+00 : f32
    %277 = vector.broadcast %cst_200 : f32 to vector<8x8xf32>
    %278 = arith.select %276, %238, %277 : vector<8x8xi1>, vector<8x8xf32>
    %cst_201 = arith.constant dense<0x7F800000> : vector<8xf32>
    %279 = vector.multi_reduction <minimumf>, %278, %cst_201 [1] : vector<8x8xf32> to vector<8xf32>
    %280 = vector.shape_cast %279 : vector<8xf32> to vector<8x1xf32>
    %281 = vector.broadcast %280 : vector<8x1xf32> to vector<8x8xf32>
    %282 = arith.cmpf oeq, %238, %281 : vector<8x8xf32>
    %283 = arith.extui %282 : vector<8x8xi1> to vector<8x8xi32>
    %284 = arith.sitofp %283 : vector<8x8xi32> to vector<8x8xf32>
    %285 = arith.addf %268, %284 : vector<8x8xf32>
    %cst_202 = arith.constant 0.000000e+00 : f32
    %286 = vector.broadcast %cst_202 : f32 to vector<8x8xf32>
    %287 = arith.cmpf ogt, %284, %286 : vector<8x8xf32>
    %cst_203 = arith.constant -1.000000e+00 : f32
    %288 = vector.broadcast %cst_203 : f32 to vector<8x8xf32>
    %289 = arith.select %287, %288, %272 : vector<8x8xi1>, vector<8x8xf32>
    %cst_204 = arith.constant dense<0xFF800000> : vector<8xf32>
    %290 = vector.multi_reduction <maximumf>, %289, %cst_204 [1] : vector<8x8xf32> to vector<8xf32>
    %291 = vector.shape_cast %290 : vector<8xf32> to vector<8x1xf32>
    %292 = vector.broadcast %291 : vector<8x1xf32> to vector<8x8xf32>
    %293 = arith.cmpf oeq, %289, %292 : vector<8x8xf32>
    %cst_205 = arith.constant 8.000000e+00 : f32
    %294 = vector.broadcast %cst_205 : f32 to vector<8x8xf32>
    %295 = arith.select %293, %238, %294 : vector<8x8xi1>, vector<8x8xf32>
    %cst_206 = arith.constant dense<0x7F800000> : vector<8xf32>
    %296 = vector.multi_reduction <minimumf>, %295, %cst_206 [1] : vector<8x8xf32> to vector<8xf32>
    %297 = vector.shape_cast %296 : vector<8xf32> to vector<8x1xf32>
    %298 = vector.broadcast %297 : vector<8x1xf32> to vector<8x8xf32>
    %299 = arith.cmpf oeq, %238, %298 : vector<8x8xf32>
    %300 = arith.extui %299 : vector<8x8xi1> to vector<8x8xi32>
    %301 = arith.sitofp %300 : vector<8x8xi32> to vector<8x8xf32>
    %302 = arith.addf %285, %301 : vector<8x8xf32>
    %cst_207 = arith.constant 0.000000e+00 : f32
    %303 = vector.broadcast %cst_207 : f32 to vector<8x8xf32>
    %304 = arith.cmpf ogt, %301, %303 : vector<8x8xf32>
    %cst_208 = arith.constant -1.000000e+00 : f32
    %305 = vector.broadcast %cst_208 : f32 to vector<8x8xf32>
    %306 = arith.select %304, %305, %289 : vector<8x8xi1>, vector<8x8xf32>
    %cst_209 = arith.constant dense<0xFF800000> : vector<8xf32>
    %307 = vector.multi_reduction <maximumf>, %306, %cst_209 [1] : vector<8x8xf32> to vector<8xf32>
    %308 = vector.shape_cast %307 : vector<8xf32> to vector<8x1xf32>
    %309 = vector.broadcast %308 : vector<8x1xf32> to vector<8x8xf32>
    %310 = arith.cmpf oeq, %306, %309 : vector<8x8xf32>
    %cst_210 = arith.constant 8.000000e+00 : f32
    %311 = vector.broadcast %cst_210 : f32 to vector<8x8xf32>
    %312 = arith.select %310, %238, %311 : vector<8x8xi1>, vector<8x8xf32>
    %cst_211 = arith.constant dense<0x7F800000> : vector<8xf32>
    %313 = vector.multi_reduction <minimumf>, %312, %cst_211 [1] : vector<8x8xf32> to vector<8xf32>
    %314 = vector.shape_cast %313 : vector<8xf32> to vector<8x1xf32>
    %315 = vector.broadcast %314 : vector<8x1xf32> to vector<8x8xf32>
    %316 = arith.cmpf oeq, %238, %315 : vector<8x8xf32>
    %317 = arith.extui %316 : vector<8x8xi1> to vector<8x8xi32>
    %318 = arith.sitofp %317 : vector<8x8xi32> to vector<8x8xf32>
    %319 = arith.addf %302, %318 : vector<8x8xf32>
    %cst_212 = arith.constant 0.000000e+00 : f32
    %320 = vector.broadcast %cst_212 : f32 to vector<8x8xf32>
    %321 = arith.cmpf ogt, %318, %320 : vector<8x8xf32>
    %cst_213 = arith.constant -1.000000e+00 : f32
    %322 = vector.broadcast %cst_213 : f32 to vector<8x8xf32>
    %323 = arith.select %321, %322, %306 : vector<8x8xi1>, vector<8x8xf32>
    %cst_214 = arith.constant dense<0xFF800000> : vector<8xf32>
    %324 = vector.multi_reduction <maximumf>, %323, %cst_214 [1] : vector<8x8xf32> to vector<8xf32>
    %325 = vector.shape_cast %324 : vector<8xf32> to vector<8x1xf32>
    %326 = vector.broadcast %325 : vector<8x1xf32> to vector<8x8xf32>
    %327 = arith.cmpf oeq, %323, %326 : vector<8x8xf32>
    %cst_215 = arith.constant 8.000000e+00 : f32
    %328 = vector.broadcast %cst_215 : f32 to vector<8x8xf32>
    %329 = arith.select %327, %238, %328 : vector<8x8xi1>, vector<8x8xf32>
    %cst_216 = arith.constant dense<0x7F800000> : vector<8xf32>
    %330 = vector.multi_reduction <minimumf>, %329, %cst_216 [1] : vector<8x8xf32> to vector<8xf32>
    %331 = vector.shape_cast %330 : vector<8xf32> to vector<8x1xf32>
    %332 = vector.broadcast %331 : vector<8x1xf32> to vector<8x8xf32>
    %333 = arith.cmpf oeq, %238, %332 : vector<8x8xf32>
    %334 = arith.extui %333 : vector<8x8xi1> to vector<8x8xi32>
    %335 = arith.sitofp %334 : vector<8x8xi32> to vector<8x8xf32>
    %336 = arith.addf %319, %335 : vector<8x8xf32>
    %cst_217 = arith.constant dense<0.000000e+00> : vector<8x8xf32>
    %337 = tpu.matmul %237, %336, %cst_217 {dimension_numbers = #tpu.dot_dimension_numbers<[1], [1], [0], [0], [0, 0, 1, 0], [], []>} : vector<8x8xf32>, vector<8x8xf32>, vector<8x8xf32> -> vector<8x8xf32>
    %338 = arith.addf %336, %337 : vector<8x8xf32>
    %cst_218 = arith.constant 0.000000e+00 : f32
    %339 = vector.broadcast %cst_218 : f32 to vector<8x8xf32>
    %340 = arith.cmpf ogt, %338, %339 : vector<8x8xf32>
    %341 = arith.extui %340 : vector<8x8xi1> to vector<8x8xi32>
    %342 = arith.sitofp %341 : vector<8x8xi32> to vector<8x8xf32>
    %c0_219 = arith.constant 0 : index
    %c0_220 = arith.constant 0 : index
    %343 = vector.load %arg18[%c0_219, %c0_220] : memref<8x8xf32, #tpu.memory_space<vmem>>, vector<8x8xf32>
    tpu.vector_store %arg18[%c0_219, %c0_220], %342 {strides = array<i32>} : memref<8x8xf32, #tpu.memory_space<vmem>>, vector<8x8xf32>,
    %cst_221 = arith.constant dense<0.000000e+00> : vector<8xf32>
    %344 = vector.multi_reduction <add>, %342, %cst_221 [1] : vector<8x8xf32> to vector<8xf32>
    %345 = vector.shape_cast %344 : vector<8xf32> to vector<8x1xf32>
    %cst_222 = arith.constant 1.000000e+00 : f32
    %346 = vector.broadcast %cst_222 : f32 to vector<8x1xf32>
    %347 = arith.maximumf %345, %346 : vector<8x1xf32>
    %cst_223 = arith.constant 1.000000e+00 : f32
    %348 = vector.broadcast %cst_223 : f32 to vector<8x1xf32>
    %349 = arith.divf %348, %347 : vector<8x1xf32>
    %cst_224 = arith.constant dense<0.000000e+00> : vector<8x10xf32>
    %350 = tpu.matmul %342, %215, %cst_224 {dimension_numbers = #tpu.dot_dimension_numbers<[1], [0], [0], [1], [0, 0, 1, 1], [], []>} : vector<8x8xf32>, vector<8x10xf32>, vector<8x10xf32> -> vector<8x10xf32>
    %351 = vector.broadcast %349 : vector<8x1xf32> to vector<8x10xf32>
    %352 = arith.mulf %350, %351 : vector<8x10xf32>
    %c0_225 = arith.constant 0 : index
    %c0_226 = arith.constant 0 : index
    %353 = vector.load %arg7[%c0_225, %c0_226] : memref<10x15xf32, #tpu.memory_space<vmem>>, vector<10x15xf32>
    %cst_227 = arith.constant dense<0.000000e+00> : vector<8x15xf32>
    %354 = tpu.matmul %352, %353, %cst_227 {dimension_numbers = #tpu.dot_dimension_numbers<[1], [0], [0], [1], [0, 0, 1, 1], [], []>} : vector<8x10xf32>, vector<10x15xf32>, vector<8x15xf32> -> vector<8x15xf32>
    %c0_228 = arith.constant 0 : index
    %c0_229 = arith.constant 0 : index
    %355 = vector.load %arg9[%c0_228, %c0_229] : memref<1x15xf32, #tpu.memory_space<vmem>>, vector<1x15xf32>
    %356 = vector.broadcast %355 : vector<1x15xf32> to vector<8x15xf32>
    %357 = arith.addf %354, %356 : vector<8x15xf32>
    %c0_230 = arith.constant 0 : index
    %c0_231 = arith.constant 0 : index
    %358 = vector.load %arg8[%c0_230, %c0_231] : memref<10x15xf32, #tpu.memory_space<vmem>>, vector<10x15xf32>
    %cst_232 = arith.constant dense<0.000000e+00> : vector<8x15xf32>
    %359 = tpu.matmul %215, %358, %cst_232 {dimension_numbers = #tpu.dot_dimension_numbers<[1], [0], [0], [1], [0, 0, 1, 1], [], []>} : vector<8x10xf32>, vector<10x15xf32>, vector<8x15xf32> -> vector<8x15xf32>
    %360 = arith.addf %357, %359 : vector<8x15xf32>
    %cst_233 = arith.constant 0.000000e+00 : f32
    %361 = vector.broadcast %cst_233 : f32 to vector<8x15xf32>
    %362 = arith.maximumf %360, %361 : vector<8x15xf32>
    %cst_234 = arith.constant dense<0.000000e+00> : vector<8x15xf32>
    %363 = tpu.matmul %342, %362, %cst_234 {dimension_numbers = #tpu.dot_dimension_numbers<[1], [0], [0], [1], [0, 0, 1, 1], [], []>} : vector<8x8xf32>, vector<8x15xf32>, vector<8x15xf32> -> vector<8x15xf32>
    %364 = vector.broadcast %349 : vector<8x1xf32> to vector<8x15xf32>
    %365 = arith.mulf %363, %364 : vector<8x15xf32>
    %c0_235 = arith.constant 0 : index
    %c0_236 = arith.constant 0 : index
    %366 = vector.load %arg10[%c0_235, %c0_236] : memref<15x10xf32, #tpu.memory_space<vmem>>, vector<15x10xf32>
    %cst_237 = arith.constant dense<0.000000e+00> : vector<8x10xf32>
    %367 = tpu.matmul %365, %366, %cst_237 {dimension_numbers = #tpu.dot_dimension_numbers<[1], [0], [0], [1], [0, 0, 1, 1], [], []>} : vector<8x15xf32>, vector<15x10xf32>, vector<8x10xf32> -> vector<8x10xf32>
    %c0_238 = arith.constant 0 : index
    %c0_239 = arith.constant 0 : index
    %368 = vector.load %arg12[%c0_238, %c0_239] : memref<1x10xf32, #tpu.memory_space<vmem>>, vector<1x10xf32>
    %369 = vector.broadcast %368 : vector<1x10xf32> to vector<8x10xf32>
    %370 = arith.addf %367, %369 : vector<8x10xf32>
    %c0_240 = arith.constant 0 : index
    %c0_241 = arith.constant 0 : index
    %371 = vector.load %arg11[%c0_240, %c0_241] : memref<15x10xf32, #tpu.memory_space<vmem>>, vector<15x10xf32>
    %cst_242 = arith.constant dense<0.000000e+00> : vector<8x10xf32>
    %372 = tpu.matmul %362, %371, %cst_242 {dimension_numbers = #tpu.dot_dimension_numbers<[1], [0], [0], [1], [0, 0, 1, 1], [], []>} : vector<8x15xf32>, vector<15x10xf32>, vector<8x10xf32> -> vector<8x10xf32>
    %373 = arith.addf %370, %372 : vector<8x10xf32>
    %c0_243 = arith.constant 0 : index
    %c0_244 = arith.constant 0 : index
    %374 = vector.load %arg17[%c0_243, %c0_244] : memref<8x10xf32, #tpu.memory_space<vmem>>, vector<8x10xf32>
    tpu.vector_store %arg17[%c0_243, %c0_244], %373 {strides = array<i32>} : memref<8x10xf32, #tpu.memory_space<vmem>>, vector<8x10xf32>,
    %c0_245 = arith.constant 0 : index
    %c0_246 = arith.constant 0 : index
    %375 = vector.load %arg13[%c0_245, %c0_246] : memref<10x3xf32, #tpu.memory_space<vmem>>, vector<10x3xf32>
    %cst_247 = arith.constant dense<0.000000e+00> : vector<8x3xf32>
    %376 = tpu.matmul %373, %375, %cst_247 {dimension_numbers = #tpu.dot_dimension_numbers<[1], [0], [0], [1], [0, 0, 1, 1], [], []>} : vector<8x10xf32>, vector<10x3xf32>, vector<8x3xf32> -> vector<8x3xf32>
    %c0_248 = arith.constant 0 : index
    %c0_249 = arith.constant 0 : index
    %377 = vector.load %arg14[%c0_248, %c0_249] : memref<1x3xf32, #tpu.memory_space<vmem>>, vector<1x3xf32>
    %378 = vector.broadcast %377 : vector<1x3xf32> to vector<8x3xf32>
    %379 = arith.addf %376, %378 : vector<8x3xf32>
    %cst_250 = arith.constant dense<0xFF800000> : vector<8xf32>
    %380 = vector.multi_reduction <maximumf>, %379, %cst_250 [1] : vector<8x3xf32> to vector<8xf32>
    %381 = vector.shape_cast %380 : vector<8xf32> to vector<8x1xf32>
    %382 = vector.broadcast %381 : vector<8x1xf32> to vector<8x3xf32>
    %383 = arith.subf %379, %382 : vector<8x3xf32>
    %384 = math.exp %383 : vector<8x3xf32>
    %cst_251 = arith.constant dense<0.000000e+00> : vector<8xf32>
    %385 = vector.multi_reduction <add>, %384, %cst_251 [1] : vector<8x3xf32> to vector<8xf32>
    %386 = vector.shape_cast %385 : vector<8xf32> to vector<8x1xf32>
    %387 = vector.broadcast %386 : vector<8x1xf32> to vector<8x3xf32>
    %388 = arith.divf %384, %387 : vector<8x3xf32>
    %c0_252 = arith.constant 0 : index
    %c0_253 = arith.constant 0 : index
    %389 = vector.load %arg15[%c0_252, %c0_253] : memref<8x3xf32, #tpu.memory_space<vmem>>, vector<8x3xf32>
    tpu.vector_store %arg15[%c0_252, %c0_253], %388 {strides = array<i32>} : memref<8x3xf32, #tpu.memory_space<vmem>>, vector<8x3xf32>,
    return
  }
}

</mosaic_0001>

<bundles_post_ra>
// kernel: gnn_forward.1
= control target key start
LH: loop header
LB: loop body
LE: loop exit
PB: predicated region body
PF: predicated region fallthrough
CT: control target
= control target key end

     0   :  { %s3083_s0 = inlined_call_operand.vmem [shape: f32[5,8,60], index: 0, kind: input, shape index: {}]   ;;  %s3084_s1 = inlined_call_operand.vmem [shape: f32[8,3], index: 1, kind: input, shape index: {}]   ;;  %s3085_s2 = inlined_call_operand.vmem [shape: f32[5,5], index: 2, kind: input, shape index: {}]   ;;  %s3086_s3 = inlined_call_operand.vmem [shape: f32[60,20], index: 3, kind: input, shape index: {}]   ;;  %s3087_s4 = inlined_call_operand.vmem [shape: f32[1,20], index: 4, kind: input, shape index: {}]   ;;  %s3088_s5 = inlined_call_operand.vmem [shape: f32[5,20,10], index: 5, kind: input, shape index: {}]   ;;  %s3089_s6 = inlined_call_operand.vmem [shape: f32[1,10], index: 6, kind: input, shape index: {}]   ;;  %s3090_s7 = inlined_call_operand.vmem [shape: f32[10,15], index: 7, kind: input, shape index: {}]   ;;  %s3091_s8 = inlined_call_operand.vmem [shape: f32[10,15], index: 8, kind: input, shape index: {}]   ;;  %s3092_s9 = inlined_call_operand.vmem [shape: f32[1,15], index: 9, kind: input, shape index: {}]   ;;  %s3093_s10 = inlined_call_operand.vmem [shape: f32[15,10], index: 10, kind: input, shape index: {}]   ;;  %s3094_s11 = inlined_call_operand.vmem [shape: f32[15,10], index: 11, kind: input, shape index: {}]   ;;  %s3095_s12 = inlined_call_operand.vmem [shape: f32[1,10], index: 12, kind: input, shape index: {}]   ;;  %s3096_s13 = inlined_call_operand.vmem [shape: f32[10,3], index: 13, kind: input, shape index: {}]   ;;  %s3097_s14 = inlined_call_operand.vmem [shape: f32[1,3], index: 14, kind: input, shape index: {}]   ;;  %s3098_s15 = inlined_call_operand.vmem [shape: f32[8,3], index: 15, kind: output, shape index: {0}]   ;;  %s3099_s16 = inlined_call_operand.hbm [shape: f32[8,10], index: 16, kind: output, shape index: {1}]   ;;  %s3100_s17 = inlined_call_operand.hbm [shape: f32[8,10], index: 17, kind: output, shape index: {2}]   ;;  %s3101_s18 = inlined_call_operand.hbm [shape: f32[8,8], index: 18, kind: output, shape index: {3}]  }
   0x1   :  { %3104 = sst [smem:[#allocation12_spill]] %s3083_s0 }
   0x2   :  { %3105 = sst [smem:[#allocation13_spill]] %s3084_s1 }
   0x3   :  { %3106 = sst [smem:[#allocation14_spill]] %s3085_s2 }
   0x4   :  { %3107 = sst [smem:[#allocation15_spill]] %s3098_s15 }
   0x5   :  { %3108 = sst [smem:[#allocation16_spill]] %s3101_s18 }
   0x6   :  { %24 = vsyncpa [#allocation4], 0 }
   0x7   :  { %25 = vsyncpa [#allocation3], 0 }
   0x8   :  { %26 = vsyncpa [#allocation7], 0  ;;  %s3109_s29 = sld [smem:[#allocation14_spill]] }
   0xe   :  { %s37_s30 = sshll.u32 %s3109_s29, 4  ;;  %s38_s30 = int_to_ptr.vmem [resolvable:$true] %s37_s30 }
   0xf   :  { %s2441_s0 = scalar_lea.vmem %s38_s30, 128  ;;  %p2446_p1 = scmp.lt.s32.totalorder %s38_s30, %s38_s30 }
  0x10   :  { %p2442_p0 = scmp.ne.s32.totalorder %s38_s30, %s2441_s0  ;;  %p2447_p2 = scmp.lt.s32.totalorder %s2441_s0, %s2441_s0 }
  0x12   :  { %p2448_p3 = por %p2447_p2, %p2446_p1 }
  0x14   :  { %p2449_p4 = pnand %p2448_p3, %p2442_p0 }
  0x16   :  { %2452 = shalt.err (!%p2449_p4)
}
  0x17   :  { %s2525_s19 = smov [#allocation2]  }
  0x18   :  { %40 = dma.vmem_to_smem %s38_s30, 128, %s2525_s19, [#allocation4]  }
  0x19   :  { %2519 = dma.done.wait [#allocation4], 128  }
  0x1a   :  { %2520 = vsyncadd [#allocation4], 4294967168 }
  0x1b   :  { %68 = sfence }
  0x1c   :  { %v98_v0 = vld [vmem:[%s3086_s3] sm:$0xff]  ;;  %v99_v1 = vld [vmem:[%s3086_s3 + $0x8] sm:$0xff]  ;;  %v100_v2 = vld [vmem:[%s3086_s3 + $0x10] sm:$0xff]  ;;  %v2526_v3 = vmov 0.0|0.0   ;;  %vm2527_vm0 = vmmov 0   ;;  %v2528_v6 = vmov 0.0  }
  0x1d   :  { %2319 = vmatprep.subr.bf16.mxu0 %v2526_v3  ;;  %2332 = vmatprep.subr.bf16.mxu1 %v2526_v3  ;;  %v2642_v4 = vpack.c.bf16 %v99_v1, %v98_v0  ;;  %v101_v5 = vld [vmem:[%s3086_s3 + $0x18] sm:$0xff]  ;;  %s2651_s26 = sld [smem:[#allocation2]]  ;;  %v102_v8 = vld [vmem:[%s3086_s3 + $0x20] sm:$0xff]  ;;  %v103_v9 = vld [vmem:[%s3086_s3 + $0x28] sm:$0xff]  ;;  %s2667_s21 = sld [smem:[#allocation2 + $0x1]]  ;;  %vm117_vm1 = vcmask 1043456  }
  0x1e   :  { %2135 = vmatprep.mubr.msk.f32.mxu0 %vm2527_vm0, %v2528_v6  ;;  %2154 = vmatprep.mubr.msk.f32.mxu1 %vm2527_vm0, %v2528_v6  ;;  %v2655_v7 = vpack.c.bf16 %v101_v5, %v100_v2  ;;  %s1938_s27 = sld [smem:[#allocation2 + $0x80]]  ;;  %s2669_s22 = sld [smem:[#allocation2 + $0x81]]  ;;  %v104_v10 = vld [vmem:[%s3086_s3 + $0x30] sm:$0xff]  ;;  %v2685_v12 = vpack.c.bf16 %v103_v9, %v102_v8  ;;  %v105_v13 = vld [vmem:[%s3086_s3 + $0x38] sm:$0xf]  ;;  %vm2529_vm2 = vmmov 1  }
  0x1f   :  { %2321 = vmatpush3.bf16.msra.mxu0 %v2642_v4  ;;  %2334 = vmatpush3.bf16.msra.mxu1 %v2642_v4  ;;  %s1940_s28 = sld [smem:[#allocation2 + $0x100]]  ;;  %s3110_s29 = sld [smem:[#allocation12_spill]]  ;;  %v2711_v21 = vpack.c.bf16 %v105_v13, %v104_v10  ;;  %vm2730_vm3 = vmpackc.low %vm117_vm1, %vm2529_vm2  ;;  %v1956_v45 = vld [vmem:[%s3088_s5 + $0x18] sm:$0xff]  ;;  %v1957_v46 = vld [vmem:[%s3088_s5 + $0x20] sm:$0xff]  ;;  %vm113_vm4 = vcmask 490496   ;;  %vm293_vm5 = vcmask 162816  }
  0x20   :  { %2322 = vmatprep.subr.bf16.mxu0 %v2526_v3  ;;  %2335 = vmatprep.subr.bf16.mxu1 %v2526_v3  ;;  %s1942_s1 = sld [smem:[#allocation2 + $0x180]]  ;;  %s2679_s30 = sld [smem:[#allocation2 + $0x101]]  ;;  %v2346_v49 = vpack.c.bf16 %v1957_v46, %v1956_v45  ;;  %v192_v53 = vld [vmem:[%s3088_s5] sm:$0xff]  ;;  %v193_v54 = vld [vmem:[%s3088_s5 + $0x8] sm:$0xff]  ;;  %v194_v57 = vld [vmem:[%s3088_s5 + $0x10] sm:$0xf] }
  0x21   :  { %s2665_s20 = sld [smem:[#allocation2 + $0x200]]  ;;  %s2681_s0 = sld [smem:[#allocation2 + $0x181]]  ;;  %v2349_v55 = vpack.c.bf16 %v193_v54, %v192_v53  ;;  %v1958_v56 = vld [vmem:[%s3088_s5 + $0x28] sm:$0xf]  ;;  %v2784_v60 = vld [vmem:[%s3087_s4] ss:$0 sm:$0xff] }
  0x22   :  { %s2700_s18 = sld [smem:[#allocation2 + $0x201]]  ;;  %s1963_s24 = sld [smem:[#allocation2 + $0x2]]  ;;  %vm980_vm6 = vcmask 80896   ;;  %vm983_vm7 = vcmask 23552   ;;  %vm1148_vm9 = vcmask 64512  }
  0x23   :  { %2324 = vmatpush3.bf16.msra.mxu0 %v2655_v7  ;;  %2337 = vmatpush3.bf16.msra.mxu1 %v2655_v7  ;;  %v71_v16 = vstv %s2651_s26  ;;  %v196_v28 = vstv %s2667_s21  ;;  %s1964_s25 = sld [smem:[#allocation2 + $0x82]]  ;;  %s1979_s2 = sld [smem:[#allocation2 + $0x203]] }
  0x24   :  { %2325 = vmatprep.subr.bf16.mxu0 %v2526_v3  ;;  %2338 = vmatprep.subr.bf16.mxu1 %v2526_v3  ;;  %v76_v19 = vstv %s1938_s27  ;;  %v199_v29 = vstv %s2669_s22  ;;  %s1965_s3 = sld [smem:[#allocation2 + $0x102]]  ;;  %s1975_s22 = sld [smem:[#allocation2 + $0x3]] }
  0x25   :  { %v2677_v11 = vld [vmem:[%s3110_s29] sm:$0xff]  ;;  %v2693_v14 = vld [vmem:[%s3110_s29 + $0x8] sm:$0xff]  ;;  %v2698_v15 = vld [vmem:[%s3110_s29 + $0x10] sm:$0xff]  ;;  %v82_v20 = vstv %s1940_s28  ;;  %s1966_s15 = sld [smem:[#allocation2 + $0x182]]  ;;  %s1987_s19 = sld [smem:[#allocation2 + $0x4]] }
  0x26   :  { %v2708_v17 = vld [vmem:[%s3110_s29 + $0x18] sm:$0xff]  ;;  %v72_v18 = vmul.f32 %v71_v16, %v2677_v11  ;;  %v77_v22 = vmul.f32 %v2693_v14, %v76_v19  ;;  %v83_v23 = vmul.f32 %v2698_v15, %v82_v20  ;;  %v88_v24 = vstv %s1942_s1  ;;  %v2721_v26 = vld [vmem:[%s3110_s29 + $0x20] sm:$0xff]  ;;  %s1976_s29 = sld [smem:[#allocation2 + $0x83]]  ;;  %s1989_s4 = sld [smem:[#allocation2 + $0x104]] }
  0x27   :  { %2327 = vmatpush3.bf16.msra.mxu0 %v2685_v12  ;;  %2340 = vmatpush3.bf16.msra.mxu1 %v2685_v12  ;;  %v89_v25 = vmul.f32 %v2708_v17, %v88_v24  ;;  %v94_v27 = vstv %s2665_s20  ;;  %v197_v32 = vmul.f32 %v196_v28, %v2677_v11  ;;  %v200_v33 = vmul.f32 %v2693_v14, %v199_v29  ;;  %v1970_v29 = vld [vmem:[%s3088_s5 + $0x30] sm:$0xff]  ;;  %s1990_s27 = sld [smem:[#allocation2 + $0x184]] }
  0x28   :  { %2328 = vmatprep.subr.bf16.mxu0 %v2526_v3  ;;  %2341 = vmatprep.subr.bf16.mxu1 %v2526_v3  ;;  %v78_v31 = vadd.f32 %v77_v22, %v72_v18  ;;  %v203_v34 = vstv %s2679_s30  ;;  %v207_v36 = vstv %s2681_s0  ;;  %v211_v37 = vstv %s2700_s18  ;;  %s1967_s18 = sld [smem:[#allocation2 + $0x202]]  ;;  %s1977_s30 = sld [smem:[#allocation2 + $0x103]] }
  0x29   :  { %v204_v35 = vmul.f32 %v2698_v15, %v203_v34  ;;  %v95_v39 = vmul.f32 %v2721_v26, %v94_v27  ;;  %v201_v40 = vadd.f32 %v200_v33, %v197_v32  ;;  %v208_v41 = vmul.f32 %v2708_v17, %v207_v36  ;;  %v1972_v33 = vld [vmem:[%s3088_s5 + $0x40] sm:$0xf]  ;;  %s1978_s0 = sld [smem:[#allocation2 + $0x183]]  ;;  %s1991_s28 = sld [smem:[#allocation2 + $0x204]] }
  0x2a   :  { %v84_v38 = vadd.f32 %v83_v23, %v78_v31  ;;  %v212_v44 = vmul.f32 %v2721_v26, %v211_v37  ;;  %v447_v58 = vstv %s1963_s24  ;;  %v450_v59 = vstv %s1964_s25  ;;  %v1971_v31 = vld [vmem:[%s3088_s5 + $0x38] sm:$0xff]  ;;  %s3113_s23 = sld [smem:[#allocation13_spill]]  ;;  %s2531_s24 = smov [#allocation5]  }
  0x2b   :  { %2331 = vmatpush3.bf16.msk.msra.mxu0 %vm2730_vm3, %v2711_v21  ;;  %2344 = vmatpush3.bf16.msk.msra.mxu1 %vm2730_vm3, %v2711_v21  ;;  %v205_v43 = vadd.f32 %v204_v35, %v201_v40  ;;  %v448_v61 = vmul.f32 %v447_v58, %v2677_v11  ;;  %v451_v62 = vmul.f32 %v2693_v14, %v450_v59  ;;  %v454_v0 = vstv %s1965_s3  ;;  %v1982_v58 = vld [vmem:[%s3088_s5 + $0x48] sm:$0xff]  ;;  %v1983_v59 = vld [vmem:[%s3088_s5 + $0x50] sm:$0xff]  ;;  %s1900_s25 = sshll.u32 %s2531_s24, 4  ;;  %s1901_s25 = int_to_ptr.vmem [resolvable:$true] %s1900_s25 }
  0x2c   :  { %v90_v42 = vadd.f32 %v89_v25, %v84_v38  ;;  %2345 = vmatprep.subr.bf16.mxu0 %v2526_v3  ;;  %2348 = vmatprep.subr.bf16.mxu1 %v2526_v3  ;;  %v455_v16 = vmul.f32 %v2698_v15, %v454_v0  ;;  %v458_v18 = vstv %s1966_s15  ;;  %v2365_v32 = vpack.c.bf16 %v1971_v31, %v1970_v29 }
  0x2d   :  { %v209_v48 = vadd.f32 %v208_v41, %v205_v43  ;;  %v452_v13 = vadd.f32 %v451_v62, %v448_v61  ;;  %v459_v22 = vmul.f32 %v2708_v17, %v458_v18  ;;  %v625_v40 = vstv %s1976_s29  ;;  %v1984_v62 = vld [vmem:[%s3088_s5 + $0x58] sm:$0xf] }
  0x2e   :  { %v96_v47 = vadd.f32 %v95_v39, %v90_v42  ;;  %v462_v23 = vstv %s1967_s18  ;;  %v622_v39 = vstv %s1975_s22  ;;  %v626_v42 = vmul.f32 %v2693_v14, %v625_v40  ;;  %s1988_s18 = sld [smem:[#allocation2 + $0x84]] }
  0x2f   :  { %v213_v51 = vadd.f32 %v212_v44, %v209_v48  ;;  %v456_v20 = vadd.f32 %v455_v16, %v452_v13  ;;  %v463_v25 = vmul.f32 %v2721_v26, %v462_v23  ;;  %v623_v41 = vmul.f32 %v622_v39, %v2677_v11 }
  0x30   :  { %v97_v50 = vmax.f32 %v96_v47, 0.0  ;;  %v629_v43 = vstv %s1977_s30  ;;  %v637_v53 = vstv %s1979_s2  ;;  %v2381_v61 = vpack.c.bf16 %v1983_v59, %v1982_v58 }
  0x31   :  { %v214_v52 = vmax.f32 %v213_v51, 0.0  ;;  %v460_v24 = vadd.f32 %v459_v22, %v456_v20  ;;  %v627_v47 = vadd.f32 %v626_v42, %v623_v41  ;;  %v630_v48 = vmul.f32 %v2698_v15, %v629_v43  ;;  %v982_v41 = vld [vmem:[%s3113_s23] sm:$0xff] }
  0x32   :  { %2136 = vmatmul.mubr.msk.f32.vlgmr.msra.gmra.mrb[0].mxu0 %vm113_vm4, %v97_v50  ;;  %v808_v22 = vstv %s1990_s27 }
  0x33   :  { %2347 = vmatpush3.bf16.msra.mxu0 %v2346_v49  ;;  %2163 = vmatprep.mubr.msk.f32.mxu0 %vm2527_vm0, %v2528_v6  ;;  %v464_v27 = vadd.f32 %v463_v25, %v460_v24  ;;  %v633_v49 = vstv %s1978_s0  ;;  %v631_v51 = vadd.f32 %v630_v48, %v627_v47  ;;  %v809_v25 = vmul.f32 %v2708_v17, %v808_v22 }
  0x34   :  { %2155 = vmatmul.mubr.msk.f32.vlgmr.msra.gmra.mrb[0].mxu1 %vm113_vm4, %v214_v52  ;;  %2161 = vmatprep.subr.mxu0 %v2528_v6  ;;  %v634_v52 = vmul.f32 %v2708_v17, %v633_v49 }
  0x35   :  { %2172 = vmatprep.mubr.msk.f32.mxu1 %vm2527_vm0, %v2528_v6  ;;  %2350 = vmatpush3.bf16.msra.mxu1 %v2349_v55  ;;  %v465_v28 = vmax.f32 %v464_v27, 0.0  ;;  %v638_v55 = vmul.f32 %v2721_v26, %v637_v53  ;;  %v1140_v53 = vlaneseq }
  0x36   :  { %2170 = vmatprep.subr.mxu1 %v2528_v6  ;;  %v635_v54 = vadd.f32 %v634_v52, %v631_v51 }
  0x37   :  { %2162 = vmatpush3.msk.msra.mxu0 %vm117_vm1, %v1958_v56 }
  0x38   :  { %2351 = vmatprep.subr.bf16.mxu0 %v2526_v3  ;;  %v639_v56 = vadd.f32 %v638_v55, %v635_v54  ;;  %v2924_v54 = vand.u32 127, %v1140_v53 }
  0x39   :  { %2171 = vmatpush3.msk.msra.mxu1 %vm117_vm1, %v194_v57 }
  0x3a   :  { %2364 = vmatprep.subr.bf16.mxu1 %v2526_v3  ;;  %v640_v57 = vmax.f32 %v639_v56, 0.0  ;;  %v2927_v55 = vcvt.s32.f32 %v2924_v54 }
 0x105   :  { %v187_v63 = vpop.f32.mrb[0].mxu0 }
 0x106   :  { %v188_v1 = vadd.f32 %v2784_v60, %v187_v63  ;;  %v2137_v2 = vpop.f32.mrb[1].mxu0 }
 0x107   :  { %v284_v5 = vpop.f32.mrb[0].mxu1  ;;  %v797_v2 = vstv %s1987_s19 }
 0x108   :  { %v191_v8 = vmax.f32 %v188_v1, 0.0  ;;  %v285_v9 = vadd.f32 %v2784_v60, %v284_v5  ;;  %v2156_v10 = vpop.f32.mrb[1].mxu1  ;;  %v800_v5 = vstv %s1988_s18 }
 0x109   :  { %v804_v10 = vstv %s1989_s4 }
 0x10a   :  { %v288_v19 = vmax.f32 %v285_v9, 0.0  ;;  %2173 = vmatmul.mubr.msk.f32.vlgmr.msra.gmra.mrb[2].mxu1 %vm293_vm5, %v191_v8  ;;  %v798_v8 = vmul.f32 %v797_v2, %v2677_v11  ;;  %v801_v9 = vmul.f32 %v2693_v14, %v800_v5  ;;  %v805_v20 = vmul.f32 %v2698_v15, %v804_v10 }
 0x10b   :  { %2200 = vmatprep.mubr.msk.f32.mxu1 %vm2527_vm0, %v2528_v6  ;;  %2366 = vmatpush3.bf16.msra.mxu1 %v2365_v32  ;;  %v812_v11 = vstv %s1991_s28 }
 0x10c   :  { %2164 = vmatmul.mubr.msk.f32.vlgmr.msra.gmra.mrb[2].mxu0 %vm293_vm5, %v288_v19  ;;  %2198 = vmatprep.subr.mxu1 %v2528_v6  ;;  %v802_v19 = vadd.f32 %v801_v9, %v798_v8  ;;  %v813_v27 = vmul.f32 %v2721_v26, %v812_v11 }
 0x10d   :  { %2353 = vmatpush3.bf16.msra.mxu0 %v2642_v4  ;;  %2191 = vmatprep.mubr.msk.f32.mxu0 %vm2527_vm0, %v2528_v6 }
 0x10e   :  { %2354 = vmatprep.subr.bf16.mxu0 %v2526_v3  ;;  %v806_v24 = vadd.f32 %v805_v20, %v802_v19 }
 0x10f   :  { %2199 = vmatpush3.msk.msra.mxu1 %vm117_vm1, %v1972_v33 }
 0x110   :  { %2367 = vmatprep.subr.bf16.mxu1 %v2526_v3  ;;  %v810_v14 = vadd.f32 %v809_v25, %v806_v24 }
 0x111   :  { %2356 = vmatpush3.bf16.msra.mxu0 %v2655_v7 }
 0x112   :  { %2357 = vmatprep.subr.bf16.mxu0 %v2526_v3  ;;  %v814_v15 = vadd.f32 %v813_v27, %v810_v14 }
 0x114   :  { %v815_v17 = vmax.f32 %v814_v15, 0.0 }
 0x115   :  { %2359 = vmatpush3.bf16.msra.mxu0 %v2685_v12 }
 0x116   :  { %2360 = vmatprep.subr.bf16.mxu0 %v2526_v3 }
 0x119   :  { %2363 = vmatpush3.bf16.msk.msra.mxu0 %vm2730_vm3, %v2711_v21 }
 0x11a   :  { %2380 = vmatprep.subr.bf16.mxu0 %v2526_v3 }
 0x11c   :  { %2192 = vmatmul.mubr.msk.f32.vlgmr.msra.gmra.mrb[4].mxu0 %vm113_vm4, %v465_v28 }
 0x11d   :  { %2228 = vmatprep.mubr.msk.f32.mxu0 %vm2527_vm0, %v2528_v6  ;;  %2382 = vmatpush3.bf16.msra.mxu0 %v2381_v61 }
 0x11e   :  { %2226 = vmatprep.subr.mxu0 %v2528_v6 }
 0x121   :  { %2227 = vmatpush3.msk.msra.mxu0 %vm117_vm1, %v1984_v62 }
 0x122   :  { %2383 = vmatprep.subr.bf16.mxu0 %v2526_v3 }
 0x1dd   :  { %v442_v34 = vpop.f32.mrb[2].mxu1 }
 0x1de   :  { %v2174_v35 = vpop.f32.mrb[3].mxu1 }
 0x1df   :  { %v366_v36 = vpop.f32.mrb[2].mxu0  ;;  %v1999_v35 = vld [vmem:[%s3089_s6] ss:$0 sm:$0xff] }
 0x1e0   :  { %v443_v37 = vadd.f32 %v442_v34, %v366_v36  ;;  %v2165_v38 = vpop.f32.mrb[3].mxu0 }
 0x1ef   :  { %v535_v44 = vpop.f32.mrb[4].mxu0 }
 0x1f0   :  { %v536_v45 = vadd.f32 %v2784_v60, %v535_v44  ;;  %v2193_v46 = vpop.f32.mrb[5].mxu0 }
 0x1f2   :  { %v539_v50 = vmax.f32 %v536_v45, 0.0 }
 0x1f4   :  { %2201 = vmatmul.mubr.msk.f32.vlgmr.msra.gmra.mrb[4].mxu1 %vm293_vm5, %v539_v50 }
 0x1f5   :  { %2369 = vmatpush3.bf16.msra.mxu1 %v2642_v4  ;;  %2219 = vmatprep.mubr.msk.f32.mxu1 %vm2527_vm0, %v2528_v6 }
 0x1f6   :  { %2370 = vmatprep.subr.bf16.mxu1 %v2526_v3 }
 0x1f9   :  { %2372 = vmatpush3.bf16.msra.mxu1 %v2655_v7 }
 0x1fa   :  { %2373 = vmatprep.subr.bf16.mxu1 %v2526_v3 }
 0x1fd   :  { %2375 = vmatpush3.bf16.msra.mxu1 %v2685_v12 }
 0x1fe   :  { %2376 = vmatprep.subr.bf16.mxu1 %v2526_v3 }
 0x201   :  { %2379 = vmatpush3.bf16.msk.msra.mxu1 %vm2730_vm3, %v2711_v21 }
 0x202   :  { %2396 = vmatprep.subr.bf16.mxu1 %v2526_v3 }
 0x204   :  { %2220 = vmatmul.mubr.msk.f32.vlgmr.msra.gmra.mrb[6].mxu1 %vm113_vm4, %v640_v57 }
 0x205   :  { %2256 = vmatprep.mubr.msk.f32.mxu1 %vm2527_vm0, %v2528_v6 }
 0x2c7   :  { %v616_v63 = vpop.f32.mrb[4].mxu1 }
 0x2c8   :  { %v620_v0 = vadd.f32 %v616_v63, %v443_v37  ;;  %v2202_v1 = vpop.f32.mrb[5].mxu1 }
 0x2d7   :  { %v710_v13 = vpop.f32.mrb[6].mxu1 }
 0x2d8   :  { %v711_v16 = vadd.f32 %v2784_v60, %v710_v13  ;;  %v2221_v18 = vpop.f32.mrb[7].mxu1 }
 0x2da   :  { %v714_v23 = vmax.f32 %v711_v16, 0.0 }
 0x2dc   :  { %2229 = vmatmul.mubr.msk.f32.vlgmr.msra.gmra.mrb[6].mxu0 %vm293_vm5, %v714_v23 }
 0x2dd   :  { %2385 = vmatpush3.bf16.msra.mxu0 %v2642_v4  ;;  %2247 = vmatprep.mubr.msk.f32.mxu0 %vm2527_vm0, %v2528_v6  ;;  %v1994_v4 = vld [vmem:[%s3088_s5 + $0x60] sm:$0xff] }
 0x2de   :  { %2386 = vmatprep.subr.bf16.mxu0 %v2526_v3 }
 0x2e1   :  { %2388 = vmatpush3.bf16.msra.mxu0 %v2655_v7  ;;  %v1995_v7 = vld [vmem:[%s3088_s5 + $0x68] sm:$0xff] }
 0x2e2   :  { %2389 = vmatprep.subr.bf16.mxu0 %v2526_v3 }
 0x2e5   :  { %2391 = vmatpush3.bf16.msra.mxu0 %v2685_v12  ;;  %v2397_v12 = vpack.c.bf16 %v1995_v7, %v1994_v4 }
 0x2e6   :  { %2392 = vmatprep.subr.bf16.mxu0 %v2526_v3 }
 0x2e7   :  { %2398 = vmatpush3.bf16.msra.mxu1 %v2397_v12 }
 0x2e8   :  { %2254 = vmatprep.subr.mxu1 %v2528_v6 }
 0x2e9   :  { %2395 = vmatpush3.bf16.msk.msra.mxu0 %vm2730_vm3, %v2711_v21  ;;  %v1996_v21 = vld [vmem:[%s3088_s5 + $0x70] sm:$0xf] }
 0x2ea   :  { %2274 = vmatprep.subr.mxu0 %v2528_v6 }
 0x2eb   :  { %2255 = vmatpush3.msk.msra.mxu1 %vm117_vm1, %v1996_v21 }
 0x2ec   :  { %2248 = vmatmul.mubr.msk.f32.vlgmr.msra.gmra.mrb[8].mxu0 %vm113_vm4, %v815_v17  ;;  %2259 = vmatprep.subr.mxu1 %v2528_v6 }
 0x2ed   :  { %2276 = vmatprep.mubr.msk.f32.mxu0 %vm2527_vm0, %v2528_v6 }
 0x3af   :  { %v791_v26 = vpop.f32.mrb[6].mxu0 }
 0x3b0   :  { %v795_v30 = vadd.f32 %v791_v26, %v620_v0  ;;  %v2230_v28 = vpop.f32.mrb[7].mxu0 }
 0x3bf   :  { %v885_v29 = vpop.f32.mrb[8].mxu0 }
 0x3c0   :  { %v886_v31 = vadd.f32 %v2784_v60, %v885_v29  ;;  %v2249_v32 = vpop.f32.mrb[9].mxu0 }
 0x3c2   :  { %v889_v33 = vmax.f32 %v886_v31, 0.0 }
 0x3c4   :  { %2257 = vmatmul.mubr.msk.f32.vlgmr.msra.gmra.mrb[8].mxu1 %vm293_vm5, %v889_v33 }
 0x3c5   :  { %2261 = vmatprep.mubr.msk.f32.mxu1 %vm2527_vm0, %v2528_v6  ;;  %2260 = vmatpush3.xpose.msk.msra.mxu1 %vm983_vm7, %v982_v41 }
 0x3c6   :  { %2264 = vmatprep.subr.mxu1 %v2528_v6 }
 0x3c8   :  { %2262 = vmatmul.mubr.msk.f32.vlgmr.msra.gmra.mrb[10].mxu1 %vm983_vm7, %v982_v41 }
 0x3c9   :  { %2266 = vmatprep.mubr.msk.f32.mxu1 %vm2527_vm0, %v2528_v6 }
 0x497   :  { %v966_v34 = vpop.f32.mrb[8].mxu1 }
 0x498   :  { %v970_v36 = vadd.f32 %v966_v34, %v795_v30  ;;  %v2258_v37 = vpop.f32.mrb[9].mxu1 }
 0x49a   :  { %v978_v38 = vadd.f32 %v1999_v35, %v970_v36  ;;  %v1143_v36 = vshrl.u32 %v1140_v53, 7  ;;  %v1478_v53 = vld [vmem:[%s3091_s8 + $0x8] sm:$0x3] }
 0x49b   :  { %v1053_v46 = vpop.f32.mrb[10].mxu1 }
 0x49c   :  { %v2899_v39 = vmax.f32 %v978_v38, 0.0  ;;  %v2263_v47 = vpop.f32.mrb[11].mxu1  ;;  %vm1057_vm8 = vcmp.gt.f32.partialorder %v1053_v46, 0.0 }
 0x49d   :  { %v1058_v48 = vsel %vm1057_vm8, 1.0, %v1053_v46  ;;  %v1391_v46 = vld [vmem:[%s3090_s7] sm:$0xff]  ;;  %v1392_v47 = vld [vmem:[%s3090_s7 + $0x8] sm:$0x3] }
 0x49e   :  { %2275 = vmatpush3.msra.mxu0 %v2899_v39  ;;  %v1059_v60 = vmul.f32 %v2899_v39, %v2899_v39  ;;  %981 = vst.msk [vmem:[#allocation5] sm:$0xff] %vm980_vm6, %v2899_v39 }
 0x49f   :  { %2293 = vmatprep.subr.mxu0 %v2528_v6 }
 0x4a0   :  { %v1060_v40 = vsel %vm980_vm6, %v1059_v60, 0.0 }
 0x4a1   :  { %1061 = vadd.xlane.f32.xlu0 %v1060_v40 }
 0x52e   :  { %v1062_v42 = vpop.xlane.xlu0 %1061 }
 0x52f   :  { %v1063_v43 = vmax.f32 %v1062_v42, 1e-24 }
 0x531   :  { %2433 = vrsqrt.f32 %v1063_v43 }
 0x53b   :  { %v2434_v44 = vpop.eup %2433 }
 0x53c   :  { %v1065_v45 = vmul.f32 %v2434_v44, %v2899_v39 }
 0x53e   :  { %2265 = vmatpush3.xpose.msk.msra.mxu1 %vm980_vm6, %v1065_v45 }
 0x53f   :  { %2269 = vmatprep.subr.mxu1 %v2528_v6 }
 0x541   :  { %2267 = vmatmul.mubr.msk.f32.vlgmr.msra.gmra.mrb[12].mxu1 %vm980_vm6, %v1065_v45 }
 0x542   :  { %2271 = vmatprep.mubr.msk.f32.mxu1 %vm2527_vm0, %v2528_v6 }
 0x614   :  { %v1135_v49 = vpop.f32.mrb[12].mxu1 }
 0x615   :  { %v1139_v50 = vmul.f32 %v1135_v49, %v1058_v48  ;;  %v2268_v51 = vpop.f32.mrb[13].mxu1  ;;  %v2400_v48 = vpack.c.bf16 %v1392_v47, %v1391_v46 }
 0x617   :  { %v1149_v52 = vsel %vm1148_vm9, %v1139_v50, -inf }
 0x618   :  { %1150 = vmax.xlane.f32.xlu0 %v1149_v52  ;;  %v1477_v52 = vld [vmem:[%s3091_s8] sm:$0xff] }
 0x6a5   :  { %v1151_v56 = vpop.xlane.xlu0 %1150 }
 0x6a6   :  { %vm1152_vm10 = vcmp.eq.f32.partialorder %v1139_v50, %v1151_v56  ;;  %v2404_v56 = vpack.c.bf16 %v1478_v53, %v1477_v52 }
 0x6a7   :  { %v1153_v57 = vsel %vm1152_vm10, %v2927_v55, 8.0 }
 0x6a8   :  { %v1154_v58 = vsel %vm1148_vm9, %v1153_v57, inf }
 0x6a9   :  { %1155 = vmin.xlane.f32.xlu1 %v1154_v58 }
 0x736   :  { %v1156_v59 = vpop.xlane.xlu1 %1155 }
 0x737   :  { %vm1157_vm11 = vcmp.eq.f32.partialorder %v2927_v55, %v1156_v59  ;;  %v2015_v59 = vld [vmem:[%s3092_s9] ss:$0 sm:$0xff] }
 0x738   :  { %v2005_v61 = vsel %vm1157_vm11, 1.0, %v2528_v6 }
 0x739   :  { %vm1160_vm12 = vcmp.gt.f32.partialorder %v2005_v61, 0.0 }
 0x73a   :  { %v1161_v62 = vsel %vm1160_vm12, -1.0, %v1139_v50 }
 0x73b   :  { %v1162_v63 = vsel %vm1148_vm9, %v1161_v62, -inf }
 0x73c   :  { %1163 = vmax.xlane.f32.xlu1 %v1162_v63 }
 0x7c9   :  { %v1164_v0 = vpop.xlane.xlu1 %1163 }
 0x7ca   :  { %vm1165_vm13 = vcmp.eq.f32.partialorder %v1161_v62, %v1164_v0 }
 0x7cb   :  { %v1166_v1 = vsel %vm1165_vm13, %v2927_v55, 8.0 }
 0x7cc   :  { %v1167_v2 = vsel %vm1148_vm9, %v1166_v1, inf  ;;  %v1629_v1 = vld [vmem:[%s3093_s10 + $0x8] sm:$0x7f] }
 0x7cd   :  { %1168 = vmin.xlane.f32.xlu0 %v1167_v2 }
 0x85a   :  { %v1169_v5 = vpop.xlane.xlu0 %1168 }
 0x85b   :  { %vm1170_vm14 = vcmp.eq.f32.partialorder %v2927_v55, %v1169_v5  ;;  %v1715_v5 = vld [vmem:[%s3094_s11] sm:$0xff] }
 0x85c   :  { %v2006_v8 = vsel %vm1170_vm14, 1.0, %v2528_v6 }
 0x85d   :  { %vm1174_vm15 = vcmp.gt.f32.partialorder %v2006_v8, 0.0 }
 0x85e   :  { %v1175_v9 = vsel %vm1174_vm15, -1.0, %v1161_v62 }
 0x85f   :  { %v1176_v10 = vsel %vm1148_vm9, %v1175_v9, -inf }
 0x860   :  { %1177 = vmax.xlane.f32.xlu1 %v1176_v10 }
 0x8ed   :  { %v1178_v13 = vpop.xlane.xlu1 %1177 }
 0x8ee   :  { %vm1179_vm1 = vcmp.eq.f32.partialorder %v1175_v9, %v1178_v13 }
 0x8ef   :  { %v1180_v16 = vsel %vm1179_vm1, %v2927_v55, 8.0  ;;  %vm1144_vm1 = vcmp.eq.s32.totalorder %v1143_v36, %v2924_v54 }
 0x8f0   :  { %v1181_v18 = vsel %vm1148_vm9, %v1180_v16, inf  ;;  %v2004_v40 = vsel %vm1144_vm1, 1.0, %v2528_v6 }
 0x8f1   :  { %1182 = vmin.xlane.f32.xlu0 %v1181_v18  ;;  %v1796_v18 = vld [vmem:[%s3096_s13 + $0x8] sm:$0x3] }
 0x97e   :  { %v1183_v19 = vpop.xlane.xlu0 %1182 }
 0x97f   :  { %vm1184_vm3 = vcmp.eq.f32.partialorder %v2927_v55, %v1183_v19 }
 0x980   :  { %v2007_v20 = vsel %vm1184_vm3, 1.0, %v2528_v6 }
 0x981   :  { %vm1188_vm4 = vcmp.gt.f32.partialorder %v2007_v20, 0.0  ;;  %v1187_v27 = vadd.f32 %v2007_v20, %v2006_v8  ;;  %v1716_v8 = vld [vmem:[%s3094_s11 + $0x8] sm:$0x7f]  ;;  %v2021_v20 = vld [vmem:[%s3095_s12] ss:$0 sm:$0xff]  ;;  %s2530_s12 = smov [#allocation6]  }
 0x982   :  { %v1189_v22 = vsel %vm1188_vm4, -1.0, %v1175_v9  ;;  %vm1403_vm4 = vcmask 1041408   ;;  %v2412_v10 = vpack.c.bf16 %v1716_v8, %v1715_v5 }
 0x983   :  { %v1190_v23 = vsel %vm1148_vm9, %v1189_v22, -inf }
 0x984   :  { %1191 = vmax.xlane.f32.xlu1 %v1190_v23 }
 0xa11   :  { %v1192_v24 = vpop.xlane.xlu1 %1191 }
 0xa12   :  { %vm1193_vm5 = vcmp.eq.f32.partialorder %v1189_v22, %v1192_v24  ;;  %v2026_v24 = vld [vmem:[%s3097_s14] ss:$0 sm:$0xff] }
 0xa13   :  { %v1194_v25 = vsel %vm1193_vm5, %v2927_v55, 8.0  ;;  %vm2979_vm5 = vmpackc.low %vm1403_vm4, %vm2529_vm2 }
 0xa14   :  { %v1195_v11 = vsel %vm1148_vm9, %v1194_v25, inf }
 0xa15   :  { %1196 = vmin.xlane.f32.xlu0 %v1195_v11 }
 0xaa2   :  { %v1197_v14 = vpop.xlane.xlu0 %1196 }
 0xaa3   :  { %vm1198_vm8 = vcmp.eq.f32.partialorder %v2927_v55, %v1197_v14 }
 0xaa4   :  { %v2008_v15 = vsel %vm1198_vm8, 1.0, %v2528_v6  ;;  %vm1641_vm8 = vcmask 1046528  }
 0xaa5   :  { %v1201_v17 = vadd.f32 %v2008_v15, %v1187_v27  ;;  %vm1202_vm10 = vcmp.gt.f32.partialorder %v2008_v15, 0.0 }
 0xaa6   :  { %v1203_v4 = vsel %vm1202_vm10, -1.0, %v1189_v22  ;;  %vm2409_vm10 = vmpackc.low %vm1641_vm8, %vm2529_vm2 }
 0xaa7   :  { %v1204_v7 = vsel %vm1148_vm9, %v1203_v4, -inf }
 0xaa8   :  { %1205 = vmax.xlane.f32.xlu1 %v1204_v7 }
 0xb35   :  { %v1206_v12 = vpop.xlane.xlu1 %1205 }
 0xb36   :  { %vm1207_vm11 = vcmp.eq.f32.partialorder %v1203_v4, %v1206_v12 }
 0xb37   :  { %v1208_v21 = vsel %vm1207_vm11, %v2927_v55, 8.0 }
 0xb38   :  { %v1209_v26 = vsel %vm1148_vm9, %v1208_v21, inf }
 0xb39   :  { %1210 = vmin.xlane.f32.xlu0 %v1209_v26 }
 0xbc6   :  { %v1211_v30 = vpop.xlane.xlu0 %1210 }
 0xbc7   :  { %vm1212_vm12 = vcmp.eq.f32.partialorder %v2927_v55, %v1211_v30 }
 0xbc8   :  { %v2009_v28 = vsel %vm1212_vm12, 1.0, %v2528_v6 }
 0xbc9   :  { %v1215_v29 = vadd.f32 %v2009_v28, %v1201_v17  ;;  %vm1216_vm13 = vcmp.gt.f32.partialorder %v2009_v28, 0.0 }
 0xbca   :  { %v1217_v31 = vsel %vm1216_vm13, -1.0, %v1203_v4 }
 0xbcb   :  { %v1218_v32 = vsel %vm1148_vm9, %v1217_v31, -inf }
 0xbcc   :  { %1219 = vmax.xlane.f32.xlu1 %v1218_v32 }
 0xc59   :  { %v1220_v33 = vpop.xlane.xlu1 %1219 }
 0xc5a   :  { %vm1221_vm14 = vcmp.eq.f32.partialorder %v1217_v31, %v1220_v33 }
 0xc5b   :  { %v1222_v34 = vsel %vm1221_vm14, %v2927_v55, 8.0 }
 0xc5c   :  { %v1223_v35 = vsel %vm1148_vm9, %v1222_v34, inf }
 0xc5d   :  { %1224 = vmin.xlane.f32.xlu0 %v1223_v35 }
 0xcea   :  { %v1225_v37 = vpop.xlane.xlu0 %1224 }
 0xceb   :  { %vm1226_vm15 = vcmp.eq.f32.partialorder %v2927_v55, %v1225_v37 }
 0xcec   :  { %v2010_v38 = vsel %vm1226_vm15, 1.0, %v2528_v6 }
 0xced   :  { %v1229_v60 = vadd.f32 %v2010_v38, %v1215_v29 }
 0xcef   :  { %2270 = vmatpush3.xpose.msk.msra.mxu1 %vm1148_vm9, %v1229_v60 }
 0xcf0   :  { %2399 = vmatprep.subr.bf16.mxu1 %v2526_v3 }
 0xcf2   :  { %2272 = vmatmul.mubr.msk.f32.vlgmr.msra.gmra.mrb[14].mxu1 %vm1148_vm9, %v2004_v40 }
 0xcf3   :  { %2283 = vmatprep.mubr.msk.f32.mxu1 %vm2527_vm0, %v2528_v6  ;;  %2402 = vmatpush3.bf16.msk.msra.mxu1 %vm2979_vm5, %v2400_v48 }
 0xcf4   :  { %2403 = vmatprep.subr.bf16.mxu1 %v2526_v3 }
 0xdc5   :  { %v1302_v41 = vpop.f32.mrb[14].mxu1 }
 0xdc6   :  { %v1306_v42 = vadd.f32 %v1302_v41, %v1229_v60  ;;  %v2273_v43 = vpop.f32.mrb[15].mxu1 }
 0xdc8   :  { %vm1307_vm3 = vcmp.gt.f32.partialorder %v1306_v42, 0.0 }
 0xdc9   :  { %v2013_v44 = vsel %vm1307_vm3, 1.0, %v2528_v6 }
 0xdca   :  { %1310 = vst.msk [vmem:[#allocation8] sm:$0xff] %vm1148_vm9, %v2013_v44  ;;  %2277 = vmatmul.mubr.msk.f32.vlgmr.msra.gmra.mrb[10].mxu0 %vm1148_vm9, %v2013_v44  ;;  %v1311_v45 = vsel %vm1148_vm9, %v2013_v44, 0.0 }
 0xdcb   :  { %1312 = vadd.xlane.f32.xlu1 %v1311_v45  ;;  %2295 = vmatprep.mubr.msk.f32.mxu0 %vm2527_vm0, %v2528_v6 }
 0xe58   :  { %v1313_v50 = vpop.xlane.xlu1 %1312 }
 0xe59   :  { %v1314_v51 = vmax.f32 %v1313_v50, 1.0 }
 0xe5b   :  { %2435 = vrcp.f32 %v1314_v51 }
 0xe65   :  { %v2436_v54 = vpop.eup %2435 }
 0xe9d   :  { %v1386_v55 = vpop.f32.mrb[10].mxu0 }
 0xe9e   :  { %v1390_v57 = vmul.f32 %v2436_v54, %v1386_v55  ;;  %v2278_v58 = vpop.f32.mrb[11].mxu0 }
 0xea0   :  { %2284 = vmatmul.mubr.msk.f32.vlgmr.msra.gmra.mrb[16].mxu1 %vm980_vm6, %v1390_v57 }
 0xea1   :  { %2406 = vmatpush3.bf16.msk.msra.mxu1 %vm2979_vm5, %v2404_v56  ;;  %2290 = vmatprep.mubr.msk.f32.mxu1 %vm2527_vm0, %v2528_v6 }
 0xea2   :  { %2415 = vmatprep.subr.bf16.mxu1 %v2526_v3 }
 0xea8   :  { %2291 = vmatmul.mubr.msk.f32.vlgmr.msra.gmra.mrb[16].mxu1 %vm980_vm6, %v2899_v39  ;;  %v1628_v39 = vld [vmem:[%s3093_s10] sm:$0xff] }
 0xea9   :  { %2316 = vmatprep.mubr.msk.f32.mxu1 %vm2527_vm0, %v2528_v6  ;;  %v2408_v2 = vpack.c.bf16 %v1629_v1, %v1628_v39 }
 0xf7b   :  { %v1551_v61 = vpop.f32.mrb[16].mxu1 }
 0xf7c   :  { %v2419_v62 = vadd.f32 %v2015_v59, %v1551_v61  ;;  %v2292_v63 = vpop.f32.mrb[17].mxu1 }
 0xf7e   :  { %v1556_v0 = vmax.f32 %v2419_v62, 0.0 }
 0xf80   :  { %2294 = vmatpush3.msra.mxu0 %v1556_v0 }
 0xf81   :  { %2296 = vmatmul.mubr.msk.f32.vlgmr.msra.gmra.mrb[12].mxu0 %vm1148_vm9, %v2013_v44  ;;  %2407 = vmatprep.subr.bf16.mxu0 %v2526_v3  ;;  %vm1637_vm9 = vcmask 121856  }
 0xf82   :  { %2302 = vmatprep.mubr.msk.f32.mxu0 %vm2527_vm0, %v2528_v6  ;;  %2410 = vmatpush3.bf16.msk.msra.mxu0 %vm2409_vm10, %v2408_v2 }
 0xf83   :  { %2411 = vmatprep.subr.bf16.mxu0 %v2526_v3  ;;  %v1795_v3 = vld [vmem:[%s3096_s13] sm:$0xff]  ;;  %s1910_s13 = sshll.u32 %s2530_s12, 4  ;;  %s1911_s13 = int_to_ptr.vmem [resolvable:$true] %s1910_s13 }
 0xf84   :  { %v2416_v19 = vpack.c.bf16 %v1796_v18, %v1795_v3  ;;  %s2453_s14 = scalar_lea.vmem %s1911_s13, 128  ;;  %p2458_p6 = scmp.lt.s32.totalorder %s1911_s13, %s1911_s13 }
 0xf85   :  { %p2454_p5 = scmp.ne.s32.totalorder %s1911_s13, %s2453_s14  ;;  %p2459_p7 = scmp.lt.s32.totalorder %s2453_s14, %s2453_s14 }
 0xf86   :  { %2418 = vmatpush3.bf16.msk.msra.mxu1 %vm2979_vm5, %v2416_v19 }
 0xf87   :  { %p2460_p8 = por %p2459_p7, %p2458_p6 }
 0xf89   :  { %p2461_p9 = pnand %p2460_p8, %p2454_p5 }
0x1054   :  { %v1623_v9 = vpop.f32.mrb[12].mxu0 }
0x1055   :  { %v1627_v13 = vmul.f32 %v2436_v54, %v1623_v9  ;;  %v2297_v16 = vpop.f32.mrb[13].mxu0 }
0x1057   :  { %2303 = vmatmul.mubr.msk.f32.vlgmr.msra.gmra.mrb[14].mxu0 %vm1637_vm9, %v1627_v13 }
0x1058   :  { %2414 = vmatpush3.bf16.msk.msra.mxu0 %vm2409_vm10, %v2412_v10  ;;  %2309 = vmatprep.mubr.msk.f32.mxu0 %vm2527_vm0, %v2528_v6 }
0x105f   :  { %2310 = vmatmul.mubr.msk.f32.vlgmr.msra.gmra.mrb[14].mxu0 %vm1637_vm9, %v1556_v0 }
0x1132   :  { %v1789_v22 = vpop.f32.mrb[14].mxu0 }
0x1133   :  { %v2420_v23 = vadd.f32 %v2021_v20, %v1789_v22  ;;  %v2311_v6 = vpop.f32.mrb[15].mxu0 }
0x1135   :  { %1794 = vst.msk [vmem:[#allocation6] sm:$0xff] %vm980_vm6, %v2420_v23  ;;  %2317 = vmatmul.mubr.msk.f32.vlgmr.msra.gmra.mrb[18].mxu1 %vm980_vm6, %v2420_v23 }
0x1208   :  { %v1876_v25 = vpop.f32.mrb[18].mxu1 }
0x1209   :  { %v1877_v11 = vadd.f32 %v2026_v24, %v1876_v25  ;;  %v2318_v14 = vpop.f32.mrb[19].mxu1 }
0x120b   :  { %v1880_v27 = vsel %vm983_vm7, %v1877_v11, -inf }
0x120c   :  { %1881 = vmax.xlane.f32.xlu0 %v1880_v27 }
0x1299   :  { %v1882_v15 = vpop.xlane.xlu0 %1881 }
0x129a   :  { %v1883_v17 = vsub.f32 %v1877_v11, %v1882_v15 }
0x129c   :  { %v1884_v4 = vmul.f32 1.442695, %v1883_v17 }
0x129e   :  { %2437 = vpow2.f32 %v1884_v4 }
0x12a8   :  { %v2438_v7 = vpop.eup %2437 }
0x12a9   :  { %v1886_v12 = vsel %vm983_vm7, %v2438_v7, 0.0 }
0x12aa   :  { %1887 = vadd.xlane.f32.xlu1 %v1886_v12 }
0x12ab   :  { %2464 = shalt.err (!%p2461_p9)
}
0x12ac   :  { %s2465_s26 = scalar_lea.hbm %s3100_s17, 128 }
0x12ad   :  { %p2466_p10 = scmp.ne.s32.totalorder %s3100_s17, %s2465_s26  ;;  %p2469_p11 = scmp.lt.u32.totalorder %s2465_s26, %s3100_s17 }
0x12af   :  { %p2471_p12 = pnand %p2469_p11, %p2466_p10 }
0x12b1   :  { %2474 = shalt.err (!%p2471_p12)
}
0x12b2   :  { %1913 = dma.vmem_to_hbm [thread:$0]  %s1911_s13, 128, %s3100_s17, [#allocation7]  }
0x12b3   :  { %s2475_s28 = scalar_lea.vmem %s1901_s25, 128  ;;  %p2480_p0 = scmp.lt.s32.totalorder %s1901_s25, %s1901_s25 }
0x12b4   :  { %p2476_p13 = scmp.ne.s32.totalorder %s1901_s25, %s2475_s28  ;;  %p2481_p1 = scmp.lt.s32.totalorder %s2475_s28, %s2475_s28 }
0x12b6   :  { %p2482_p2 = por %p2481_p1, %p2480_p0 }
0x12b8   :  { %p2483_p3 = pnand %p2482_p2, %p2476_p13 }
0x12ba   :  { %2486 = shalt.err (!%p2483_p3)
}
0x12bb   :  { %s2487_s9 = scalar_lea.hbm %s3099_s16, 128 }
0x12bc   :  { %p2488_p4 = scmp.ne.s32.totalorder %s3099_s16, %s2487_s9  ;;  %p2491_p5 = scmp.lt.u32.totalorder %s2487_s9, %s3099_s16 }
0x12be   :  { %p2493_p6 = pnand %p2491_p5, %p2488_p4 }
0x12c0   :  { %2496 = shalt.err (!%p2493_p6)
}
0x12c1   :  { %1903 = dma.vmem_to_hbm [thread:$0]  %s1901_s25, 128, %s3099_s16, [#allocation3]  }
0x12c2   :  { %s2532_s0 = smov [#allocation8]  }
0x12c3   :  { %s1920_s5 = sshll.u32 %s2532_s0, 4  ;;  %s1921_s5 = int_to_ptr.vmem [resolvable:$true] %s1920_s5 }
0x12c4   :  { %s2497_s11 = scalar_lea.vmem %s1921_s5, 128  ;;  %p2502_p8 = scmp.lt.s32.totalorder %s1921_s5, %s1921_s5 }
0x12c5   :  { %p2498_p7 = scmp.ne.s32.totalorder %s1921_s5, %s2497_s11  ;;  %p2503_p9 = scmp.lt.s32.totalorder %s2497_s11, %s2497_s11 }
0x12c7   :  { %p2504_p10 = por %p2503_p9, %p2502_p8 }
0x12c9   :  { %p2505_p11 = pnand %p2504_p10, %p2498_p7 }
0x12cb   :  { %2508 = shalt.err (!%p2505_p11)
}
0x12cc   :  { %s3116_s23 = sld [smem:[#allocation16_spill]] }
0x12d2   :  { %s2509_s12 = scalar_lea.hbm %s3116_s23, 128 }
0x12d3   :  { %p2510_p12 = scmp.ne.s32.totalorder %s3116_s23, %s2509_s12  ;;  %p2513_p13 = scmp.lt.u32.totalorder %s2509_s12, %s3116_s23 }
0x12d5   :  { %p2515_p0 = pnand %p2513_p13, %p2510_p12 }
0x12d7   :  { %2518 = shalt.err (!%p2515_p0)
}
0x12d8   :  { %1923 = dma.vmem_to_hbm [thread:$0]  %s1921_s5, 128, %s3116_s23, [#allocation7]  }
0x12d9   :  { %s3117_s19 = sld [smem:[#allocation15_spill]] }
0x1337   :  { %v1888_v21 = vpop.xlane.xlu1 %1887 }
0x1338   :  { %2439 = vrcp.f32 %v1888_v21 }
0x1342   :  { %v2440_v26 = vpop.eup %2439 }
0x1343   :  { %v1890_v30 = vmul.f32 %v2440_v26, %v2438_v7 }
0x1345   :  { %1891 = vst.msk [vmem:[%s3117_s19] sm:$0xff] %vm983_vm7, %v1890_v30 }
0x1346   :  { %2521 = dma.done.wait [#allocation3], 128  }
0x1347   :  { %2522 = vsyncadd [#allocation3], 4294967168 }
0x1348   :  { %2523 = dma.done.wait [#allocation7], 256  }
0x1349   :  { %2524 = vsyncadd [#allocation7], 4294967040 }
0x134a   :  { %1935 = vsyncpa [#allocation3], 1 }
0x134b   :  { %1936 = vsyncpa [#allocation7], 1 }
0x134c   :  { %1937 = vsyncpa [#allocation4], 1 }

</bundles_post_ra>
